<compile_context>
chip_gen: v7x
topology: tpu7x:2x2x1
jax: 0.10.0
libtpu: 0.0.40
codegen_flags: <defaults>
</compile_context>

<pallas_src>
import math

import numpy as np
import jax
import jax.numpy as jnp
from jax.experimental import pallas as pl
from jax.experimental.pallas import tpu as pltpu


# ---------------------------------------------------------------------------
# The "weight" matrix from Model.weight(length): w[i] = rotate_right(v0, i); w.T
# ---------------------------------------------------------------------------
def corr_weight(length: int) -> np.ndarray:
    v0 = np.arange(1, length + 1, dtype=np.float32) / (length / 2.0)
    rows = np.stack([np.roll(v0, i) for i in range(length)], axis=0)
    return np.ascontiguousarray(rows.T)


# ---------------------------------------------------------------------------
# Kernel: one invocation, whole problem resident in VMEM (total << 1 MiB).
# ---------------------------------------------------------------------------
def make_kernel(B, L, E, H, Din, loss_const):
    R = 2 * B * L
    Dh = E // H

    def fast_recip(x):
        # EUP approx reciprocal + one Newton step (frees VALU slots).
        r = pl.reciprocal(x, approx=True)
        return r * (2.0 - x * r)

    def kernel(x_ref, wqkvT_ref, bqkvT_ref, wd1_ref, bd1_ref, g_ref, b_ref,
               amask_ref, cmask_ref, pool_ref, out_ref, loss_ref):
        f32 = jnp.float32
        x = x_ref[...].reshape(R, Din)                      # (R, Din) raw packed inputs

        # Fused (encoder ∘ QKV) projection, produced already transposed (4E, R).
        qkvT = jax.lax.dot_general(wqkvT_ref[...], x, (((1,), (1,)), ((), ())),
                                   preferred_element_type=f32) + bqkvT_ref[...]

        amask = amask_ref[...]                              # 0 in-group, -1e30 cross-group
        ctx_parts = []
        for h in range(H):                                  # static unroll, sublane slices
            qhT = qkvT[h * Dh:(h + 1) * Dh, :]              # (Dh, R)  (scale pre-folded)
            khT = qkvT[E + h * Dh:E + (h + 1) * Dh, :]      # (Dh, R)
            vhT = qkvT[2 * E + 2 * h * Dh:2 * E + 2 * (h + 1) * Dh, :]   # (2Dh, R)

            # scores transposed: sT[k, q] = k_k . q_q   (keys on sublanes)
            sT = jax.lax.dot_general(khT, qhT, (((0,), (0,)), ((), ())),
                                     preferred_element_type=f32) + amask
            sT = sT - jnp.max(sT, axis=0, keepdims=True)    # (1, R) row max over keys
            pT = jnp.exp(sT)
            denom = jnp.sum(pT, axis=0, keepdims=True)      # (1, R)

            # ctxT_h = v_hT @ pT, normalized AFTER the PV matmul
            ctxT = jax.lax.dot_general(vhT, pT, (((1,), (0,)), ((), ())),
                                       preferred_element_type=f32)       # (2Dh, R)
            ctx_parts.append(ctxT * fast_recip(denom))

        ctxT_all = jnp.concatenate(ctx_parts, axis=0)       # (2E, R) sublane concat

        # Fused residual + dense1:  o = ctx @ (I + W_d1) + b_d1   (one GEMM)
        o = jax.lax.dot_general(ctxT_all, wd1_ref[...], (((0,), (0,)), ((), ())),
                                preferred_element_type=f32) + bd1_ref[...]   # (R, E)

        # LayerNorm with per-row (per-stream) gamma/beta slabs.
        mu = jnp.mean(o, axis=-1, keepdims=True)
        var = jnp.mean((o - mu) ** 2, axis=-1, keepdims=True)
        y = (o - mu) * jax.lax.rsqrt(var + 1e-5) * g_ref[...] + b_ref[...]    # (R, E)
        out_ref[...] = y.reshape(B, 2 * L, E)

        # Correlation loss: L2-normalize rows, gram, pre-folded mask, per-batch sums.
        inv_n = jax.lax.rsqrt(jnp.maximum(jnp.sum(y * y, axis=-1, keepdims=True), 1e-24))
        yn = y * inv_n
        c = jax.lax.dot_general(yn, yn, (((1,), (1,)), ((), ())),
                                preferred_element_type=f32)                   # (R, R)
        masked = c * cmask_ref[...]                      # mask holds triu*w*0.25/denom
        per_row = jnp.sum(masked, axis=-1, keepdims=True)                     # (R, 1)
        loss_ref[...] = (jnp.sum(per_row * pool_ref[...], axis=0, keepdims=True)
                         + loss_const)                                        # (1, B)

    return kernel


# ---------------------------------------------------------------------------
# One-time weight packing (numpy, host side): encoder folded into QKV,
# stream-block-diagonal layout, scale fold, masks, per-row bias/LN slabs.
# ---------------------------------------------------------------------------
def prepare(params, B, L, H):
    p = {k: np.asarray(v, np.float32) for k, v in params.items()}
    dim_t, E = p["enc_t_w"].shape
    dim_v = p["enc_v_w"].shape[0]
    Dh = E // H
    R = 2 * B * L
    Din = dim_t + dim_v
    assert E % H == 0 and Dh % 8 == 0, "head dim must stay sublane-aligned"
    assert R % 8 == 0, "2*B*L must stay sublane-aligned"
    scale = 1.0 / math.sqrt(Dh)

    We_t, be_t = p["enc_t_w"], p["enc_t_b"]
    We_v, be_v = p["enc_v_w"], p["enc_v_b"]
    Wt, bt = p["lin_t_w"], p["lin_t_b"]          # (4,E,E), (4,E): q,k,v,dense1
    Wv, bv = p["lin_v_w"], p["lin_v_b"]

    def fold(We, be, Wl, bl):                    # compose encoder with a projection
        return We @ Wl, (be @ Wl)[0] + bl

    wq_t, bq_t = fold(We_t, be_t, Wt[0], bt[0]); wq_t, bq_t = wq_t * scale, bq_t * scale
    wk_t, bk_t = fold(We_t, be_t, Wt[1], bt[1])
    wv_t, bv_t = fold(We_t, be_t, Wt[2], bt[2])
    wq_v, bq_v = fold(We_v, be_v, Wv[0], bv[0]); wq_v, bq_v = wq_v * scale, bq_v * scale
    wk_v, bk_v = fold(We_v, be_v, Wv[1], bv[1])
    wv_v, bv_v = fold(We_v, be_v, Wv[2], bv[2])

    # Fused projection weight (Din, 4E): Q | K | V (V stream-block-diag, per-head
    # interleaved so each head's text+visual V columns are one contiguous 2*Dh block).
    W_eff = np.zeros((Din, 4 * E), np.float32)
    bias_t = np.zeros((4 * E,), np.float32)
    bias_v = np.zeros((4 * E,), np.float32)
    W_eff[:dim_t, 0:E] = wq_t;       W_eff[dim_t:, 0:E] = wq_v
    W_eff[:dim_t, E:2 * E] = wk_t;   W_eff[dim_t:, E:2 * E] = wk_v
    bias_t[0:E] = bq_t; bias_t[E:2 * E] = bk_t
    bias_v[0:E] = bq_v; bias_v[E:2 * E] = bk_v
    for h in range(H):
        c0 = 2 * E + 2 * h * Dh
        W_eff[:dim_t, c0:c0 + Dh] = wv_t[:, h * Dh:(h + 1) * Dh]
        W_eff[dim_t:, c0 + Dh:c0 + 2 * Dh] = wv_v[:, h * Dh:(h + 1) * Dh]
        bias_t[c0:c0 + Dh] = bv_t[h * Dh:(h + 1) * Dh]
        bias_v[c0 + Dh:c0 + 2 * Dh] = bv_v[h * Dh:(h + 1) * Dh]

    stream = (np.arange(R) // L) % 2                                   # 0 text, 1 visual
    bqkvT = np.where(stream[None, :] == 0, bias_t[:, None], bias_v[:, None])  # (4E, R)

    # dense1 + residual, rows reordered to match the interleaved-head ctxT layout.
    A_t = np.eye(E, dtype=np.float32) + Wt[3]
    A_v = np.eye(E, dtype=np.float32) + Wv[3]
    W_d1 = np.zeros((2 * E, E), np.float32)
    for h in range(H):
        W_d1[2 * h * Dh:2 * h * Dh + Dh, :] = A_t[h * Dh:(h + 1) * Dh, :]
        W_d1[2 * h * Dh + Dh:2 * (h + 1) * Dh, :] = A_v[h * Dh:(h + 1) * Dh, :]
    b_d1 = np.where(stream[:, None] == 0, bt[3][None, :], bv[3][None, :])      # (R, E)

    g_slab = np.where(stream[:, None] == 0, p["norm_t"][0][None, :], p["norm_v"][0][None, :])
    b_slab = np.where(stream[:, None] == 0, p["norm_t"][1][None, :], p["norm_v"][1][None, :])

    # attention group mask + correlation mask (groups = contiguous L-row blocks)
    grp = np.arange(R) // L
    amask = np.where(grp[:, None] == grp[None, :], 0.0, -1e30).astype(np.float32)
    denom_L = L * (L - 1) / 2.0
    blk = (np.triu(np.ones((L, L), np.float32), k=1) * corr_weight(L)
           * (0.5 / denom_L)).astype(np.float32)
    cmask = np.zeros((R, R), np.float32)
    for g in range(2 * B):
        cmask[g * L:(g + 1) * L, g * L:(g + 1) * L] = 0.5 * blk       # 0.5 = stream average
    loss_const = float(blk.sum())                                     # the folded "+1" term
    pool = (grp[:, None] // 2 == np.arange(B)[None, :]).astype(np.float32)     # (R, B)

    packed = tuple(jnp.asarray(a) for a in
                   (np.ascontiguousarray(W_eff.T), bqkvT, W_d1, b_d1,
                    g_slab, b_slab, amask, cmask, pool))
    return packed, loss_const, E, dim_t, dim_v, Din


def build_forward(params, B, L, H):
    packed, loss_const, E, dim_t, dim_v, Din = prepare(params, B, L, H)
    kernel = make_kernel(B, L, E, H, Din, loss_const)
    out_shape = (jax.ShapeDtypeStruct((B, 2 * L, E), jnp.float32),
                 jax.ShapeDtypeStruct((1, B), jnp.float32))

    @jax.jit
    def forward(text, visual):
        # per-call packing: block-structured raw input, batch-major / stream / pos
        xt = jnp.pad(text, ((0, 0), (0, 0), (0, dim_v)))               # (B, L, Din)
        xv = jnp.pad(visual, ((0, 0), (0, 0), (dim_t, 0)))             # (B, L, Din)
        x_in = jnp.concatenate([xt, xv], axis=1)                       # (B, 2L, Din)
        out, loss = pl.pallas_call(kernel, out_shape=out_shape)(x_in, *packed)
        return out, loss[0]

    return forward


# ---------------------------------------------------------------------------
# Deterministic parameter init (synthetic; shapes follow the PyTorch module)
# ---------------------------------------------------------------------------
def init_params(key, dim_t, dim_v, E):
    ks = jax.random.split(key, 8)
    s = 0.1
    return {
        "enc_t_w": jax.random.normal(ks[0], (dim_t, E), jnp.float32) * s,
        "enc_t_b": jax.random.normal(ks[1], (1, E), jnp.float32) * s,
        "lin_t_w": jax.random.normal(ks[2], (4, E, E), jnp.float32) * s,
        "lin_t_b": jax.random.normal(ks[3], (4, E), jnp.float32) * s,
        "norm_t": jnp.stack([jnp.ones((E,), jnp.float32), jnp.zeros((E,), jnp.float32)]),
        "enc_v_w": jax.random.normal(ks[4], (dim_v, E), jnp.float32) * s,
        "enc_v_b": jax.random.normal(ks[5], (1, E), jnp.float32) * s,
        "lin_v_w": jax.random.normal(ks[6], (4, E, E), jnp.float32) * s,
        "lin_v_b": jax.random.normal(ks[7], (4, E), jnp.float32) * s,
        "norm_v": jnp.stack([jnp.ones((E,), jnp.float32), jnp.zeros((E,), jnp.float32)]),
    }


# ---------------------------------------------------------------------------
# Pure-JAX reference (mirrors the PyTorch math) for a correctness check
# ---------------------------------------------------------------------------
def ref_forward(text, visual, p, wmask, H):
    def dpsr(x, lw, lb, nm):
        B, L, E = x.shape
        Dh = E // H
        q = x @ lw[0] + lb[0]
        k = x @ lw[1] + lb[1]
        v = x @ lw[2] + lb[2]
        split = lambda t: t.reshape(B, L, H, Dh).transpose(0, 2, 1, 3)
        qh, kh, vh = split(q), split(k), split(v)
        s = jnp.einsum("bhld,bhmd->bhlm", qh, kh) / math.sqrt(Dh)
        pr = jax.nn.softmax(s, axis=-1)
        ctx = jnp.einsum("bhlm,bhmd->bhld", pr, vh).transpose(0, 2, 1, 3).reshape(B, L, E)
        out = ctx + (ctx @ lw[3] + lb[3])
        mu = out.mean(-1, keepdims=True)
        var = ((out - mu) ** 2).mean(-1, keepdims=True)
        return (out - mu) / jnp.sqrt(var + 1e-5) * nm[0] + nm[1]

    xt = dpsr(text @ p["enc_t_w"] + p["enc_t_b"], p["lin_t_w"], p["lin_t_b"], p["norm_t"])
    xv = dpsr(visual @ p["enc_v_w"] + p["enc_v_b"], p["lin_v_w"], p["lin_v_b"], p["norm_v"])

    def corr(x):
        L = x.shape[1]
        xn = x / jnp.maximum(jnp.linalg.norm(x, axis=-1, keepdims=True), 1e-12)
        c = (jnp.einsum("bld,bmd->blm", xn, xn) + 1.0) / 2.0 * wmask[None]
        c = jnp.triu(c, k=1)
        return c.sum(axis=(1, 2)) / (L * (L - 1) / 2.0)

    loss = (corr(xt) + corr(xv)) / 2.0
    return jnp.concatenate([xt, xv], axis=1), loss


if __name__ == "__main__":
    B, L, E, H = 2, 8, 32, 4
    dim_t, dim_v = 12, 20

    key = jax.random.PRNGKey(0)
    k_text, k_vis, k_par = jax.random.split(key, 3)
    text = jax.random.normal(k_text, (B, L, dim_t), jnp.float32)
    visual = jax.random.normal(k_vis, (B, L, dim_v), jnp.float32)
    params = init_params(k_par, dim_t, dim_v, E)

    forward = build_forward(params, B, L, H)          # one-time packing + jit
    out, corr_loss = forward(text, visual)
    jax.block_until_ready((out, corr_loss))

    ref_out, ref_loss = ref_forward(text, visual, params, jnp.asarray(corr_weight(L)), H)
    assert np.allclose(np.asarray(out), np.asarray(ref_out), atol=5e-4, rtol=5e-4)
    assert np.allclose(np.asarray(corr_loss), np.asarray(ref_loss), atol=5e-4, rtol=5e-4)

    print("KERNEL_OK")
</pallas_src>

<mosaic_0001>
module attributes {stable_mosaic.version = 11 : i64} {
  func.func @kernel(%arg0: memref<2x16x32xf32, #tpu.memory_space<vmem>>, %arg1: memref<128x32xf32, #tpu.memory_space<vmem>>, %arg2: memref<128x32xf32, #tpu.memory_space<vmem>>, %arg3: memref<64x32xf32, #tpu.memory_space<vmem>>, %arg4: memref<32x32xf32, #tpu.memory_space<vmem>>, %arg5: memref<32x32xf32, #tpu.memory_space<vmem>>, %arg6: memref<32x32xf32, #tpu.memory_space<vmem>>, %arg7: memref<32x32xf32, #tpu.memory_space<vmem>>, %arg8: memref<32x32xf32, #tpu.memory_space<vmem>>, %arg9: memref<32x2xf32, #tpu.memory_space<vmem>>, %arg10: memref<2x16x32xf32, #tpu.memory_space<vmem>>, %arg11: memref<1x2xf32, #tpu.memory_space<vmem>>) attributes {dimension_semantics = [], scalar_prefetch = 0 : i64, scratch_operands = 0 : i64, tpu.core_type = #tpu.core_type<tc>} {
    %c0 = arith.constant 0 : index
    %c0_0 = arith.constant 0 : index
    %c0_1 = arith.constant 0 : index
    %0 = vector.load %arg0[%c0, %c0_0, %c0_1] : memref<2x16x32xf32, #tpu.memory_space<vmem>>, vector<2x16x32xf32>
    %1 = vector.shape_cast %0 : vector<2x16x32xf32> to vector<32x32xf32>
    %c0_2 = arith.constant 0 : index
    %c0_3 = arith.constant 0 : index
    %2 = vector.load %arg1[%c0_2, %c0_3] : memref<128x32xf32, #tpu.memory_space<vmem>>, vector<128x32xf32>
    %cst = arith.constant dense<0.000000e+00> : vector<128x32xf32>
    %3 = tpu.matmul %2, %1, %cst {dimension_numbers = #tpu.dot_dimension_numbers<[1], [1], [0], [0], [0, 0, 1, 0], [], []>} : vector<128x32xf32>, vector<32x32xf32>, vector<128x32xf32> -> vector<128x32xf32>
    %c0_4 = arith.constant 0 : index
    %c0_5 = arith.constant 0 : index
    %4 = vector.load %arg2[%c0_4, %c0_5] : memref<128x32xf32, #tpu.memory_space<vmem>>, vector<128x32xf32>
    %5 = arith.addf %3, %4 : vector<128x32xf32>
    %c0_6 = arith.constant 0 : index
    %c0_7 = arith.constant 0 : index
    %6 = vector.load %arg7[%c0_6, %c0_7] : memref<32x32xf32, #tpu.memory_space<vmem>>, vector<32x32xf32>
    %7 = vector.extract_strided_slice %5 {offsets = [0, 0], sizes = [8, 32], strides = [1, 1]} : vector<128x32xf32> to vector<8x32xf32>
    %8 = vector.extract_strided_slice %5 {offsets = [32, 0], sizes = [8, 32], strides = [1, 1]} : vector<128x32xf32> to vector<8x32xf32>
    %9 = vector.extract_strided_slice %5 {offsets = [64, 0], sizes = [16, 32], strides = [1, 1]} : vector<128x32xf32> to vector<16x32xf32>
    %cst_8 = arith.constant dense<0.000000e+00> : vector<32x32xf32>
    %10 = tpu.matmul %8, %7, %cst_8 {dimension_numbers = #tpu.dot_dimension_numbers<[0], [0], [1], [1], [0, 1, 1, 1], [], []>} : vector<8x32xf32>, vector<8x32xf32>, vector<32x32xf32> -> vector<32x32xf32>
    %11 = arith.addf %10, %6 : vector<32x32xf32>
    %cst_9 = arith.constant dense<0xFF800000> : vector<32xf32>
    %12 = vector.multi_reduction <maximumf>, %11, %cst_9 [0] : vector<32x32xf32> to vector<32xf32>
    %13 = vector.shape_cast %12 : vector<32xf32> to vector<1x32xf32>
    %14 = vector.broadcast %13 : vector<1x32xf32> to vector<32x32xf32>
    %15 = arith.subf %11, %14 : vector<32x32xf32>
    %16 = math.exp %15 : vector<32x32xf32>
    %cst_10 = arith.constant dense<0.000000e+00> : vector<32xf32>
    %17 = vector.multi_reduction <add>, %16, %cst_10 [0] : vector<32x32xf32> to vector<32xf32>
    %18 = vector.shape_cast %17 : vector<32xf32> to vector<1x32xf32>
    %cst_11 = arith.constant dense<0.000000e+00> : vector<16x32xf32>
    %19 = tpu.matmul %9, %16, %cst_11 {dimension_numbers = #tpu.dot_dimension_numbers<[1], [0], [0], [1], [0, 0, 1, 1], [], []>} : vector<16x32xf32>, vector<32x32xf32>, vector<16x32xf32> -> vector<16x32xf32>
    %20 = tpu.reciprocal %18 {approx = true} : vector<1x32xf32> -> vector<1x32xf32>
    %21 = arith.mulf %18, %20 : vector<1x32xf32>
    %cst_12 = arith.constant 2.000000e+00 : f32
    %22 = vector.broadcast %cst_12 : f32 to vector<1x32xf32>
    %23 = arith.subf %22, %21 : vector<1x32xf32>
    %24 = arith.mulf %20, %23 : vector<1x32xf32>
    %25 = vector.broadcast %24 : vector<1x32xf32> to vector<16x32xf32>
    %26 = arith.mulf %19, %25 : vector<16x32xf32>
    %27 = vector.extract_strided_slice %5 {offsets = [8, 0], sizes = [8, 32], strides = [1, 1]} : vector<128x32xf32> to vector<8x32xf32>
    %28 = vector.extract_strided_slice %5 {offsets = [40, 0], sizes = [8, 32], strides = [1, 1]} : vector<128x32xf32> to vector<8x32xf32>
    %29 = vector.extract_strided_slice %5 {offsets = [80, 0], sizes = [16, 32], strides = [1, 1]} : vector<128x32xf32> to vector<16x32xf32>
    %cst_13 = arith.constant dense<0.000000e+00> : vector<32x32xf32>
    %30 = tpu.matmul %28, %27, %cst_13 {dimension_numbers = #tpu.dot_dimension_numbers<[0], [0], [1], [1], [0, 1, 1, 1], [], []>} : vector<8x32xf32>, vector<8x32xf32>, vector<32x32xf32> -> vector<32x32xf32>
    %31 = arith.addf %30, %6 : vector<32x32xf32>
    %cst_14 = arith.constant dense<0xFF800000> : vector<32xf32>
    %32 = vector.multi_reduction <maximumf>, %31, %cst_14 [0] : vector<32x32xf32> to vector<32xf32>
    %33 = vector.shape_cast %32 : vector<32xf32> to vector<1x32xf32>
    %34 = vector.broadcast %33 : vector<1x32xf32> to vector<32x32xf32>
    %35 = arith.subf %31, %34 : vector<32x32xf32>
    %36 = math.exp %35 : vector<32x32xf32>
    %cst_15 = arith.constant dense<0.000000e+00> : vector<32xf32>
    %37 = vector.multi_reduction <add>, %36, %cst_15 [0] : vector<32x32xf32> to vector<32xf32>
    %38 = vector.shape_cast %37 : vector<32xf32> to vector<1x32xf32>
    %cst_16 = arith.constant dense<0.000000e+00> : vector<16x32xf32>
    %39 = tpu.matmul %29, %36, %cst_16 {dimension_numbers = #tpu.dot_dimension_numbers<[1], [0], [0], [1], [0, 0, 1, 1], [], []>} : vector<16x32xf32>, vector<32x32xf32>, vector<16x32xf32> -> vector<16x32xf32>
    %40 = tpu.reciprocal %38 {approx = true} : vector<1x32xf32> -> vector<1x32xf32>
    %41 = arith.mulf %38, %40 : vector<1x32xf32>
    %cst_17 = arith.constant 2.000000e+00 : f32
    %42 = vector.broadcast %cst_17 : f32 to vector<1x32xf32>
    %43 = arith.subf %42, %41 : vector<1x32xf32>
    %44 = arith.mulf %40, %43 : vector<1x32xf32>
    %45 = vector.broadcast %44 : vector<1x32xf32> to vector<16x32xf32>
    %46 = arith.mulf %39, %45 : vector<16x32xf32>
    %47 = vector.extract_strided_slice %5 {offsets = [16, 0], sizes = [8, 32], strides = [1, 1]} : vector<128x32xf32> to vector<8x32xf32>
    %48 = vector.extract_strided_slice %5 {offsets = [48, 0], sizes = [8, 32], strides = [1, 1]} : vector<128x32xf32> to vector<8x32xf32>
    %49 = vector.extract_strided_slice %5 {offsets = [96, 0], sizes = [16, 32], strides = [1, 1]} : vector<128x32xf32> to vector<16x32xf32>
    %cst_18 = arith.constant dense<0.000000e+00> : vector<32x32xf32>
    %50 = tpu.matmul %48, %47, %cst_18 {dimension_numbers = #tpu.dot_dimension_numbers<[0], [0], [1], [1], [0, 1, 1, 1], [], []>} : vector<8x32xf32>, vector<8x32xf32>, vector<32x32xf32> -> vector<32x32xf32>
    %51 = arith.addf %50, %6 : vector<32x32xf32>
    %cst_19 = arith.constant dense<0xFF800000> : vector<32xf32>
    %52 = vector.multi_reduction <maximumf>, %51, %cst_19 [0] : vector<32x32xf32> to vector<32xf32>
    %53 = vector.shape_cast %52 : vector<32xf32> to vector<1x32xf32>
    %54 = vector.broadcast %53 : vector<1x32xf32> to vector<32x32xf32>
    %55 = arith.subf %51, %54 : vector<32x32xf32>
    %56 = math.exp %55 : vector<32x32xf32>
    %cst_20 = arith.constant dense<0.000000e+00> : vector<32xf32>
    %57 = vector.multi_reduction <add>, %56, %cst_20 [0] : vector<32x32xf32> to vector<32xf32>
    %58 = vector.shape_cast %57 : vector<32xf32> to vector<1x32xf32>
    %cst_21 = arith.constant dense<0.000000e+00> : vector<16x32xf32>
    %59 = tpu.matmul %49, %56, %cst_21 {dimension_numbers = #tpu.dot_dimension_numbers<[1], [0], [0], [1], [0, 0, 1, 1], [], []>} : vector<16x32xf32>, vector<32x32xf32>, vector<16x32xf32> -> vector<16x32xf32>
    %60 = tpu.reciprocal %58 {approx = true} : vector<1x32xf32> -> vector<1x32xf32>
    %61 = arith.mulf %58, %60 : vector<1x32xf32>
    %cst_22 = arith.constant 2.000000e+00 : f32
    %62 = vector.broadcast %cst_22 : f32 to vector<1x32xf32>
    %63 = arith.subf %62, %61 : vector<1x32xf32>
    %64 = arith.mulf %60, %63 : vector<1x32xf32>
    %65 = vector.broadcast %64 : vector<1x32xf32> to vector<16x32xf32>
    %66 = arith.mulf %59, %65 : vector<16x32xf32>
    %67 = vector.extract_strided_slice %5 {offsets = [24, 0], sizes = [8, 32], strides = [1, 1]} : vector<128x32xf32> to vector<8x32xf32>
    %68 = vector.extract_strided_slice %5 {offsets = [56, 0], sizes = [8, 32], strides = [1, 1]} : vector<128x32xf32> to vector<8x32xf32>
    %69 = vector.extract_strided_slice %5 {offsets = [112, 0], sizes = [16, 32], strides = [1, 1]} : vector<128x32xf32> to vector<16x32xf32>
    %cst_23 = arith.constant dense<0.000000e+00> : vector<32x32xf32>
    %70 = tpu.matmul %68, %67, %cst_23 {dimension_numbers = #tpu.dot_dimension_numbers<[0], [0], [1], [1], [0, 1, 1, 1], [], []>} : vector<8x32xf32>, vector<8x32xf32>, vector<32x32xf32> -> vector<32x32xf32>
    %71 = arith.addf %70, %6 : vector<32x32xf32>
    %cst_24 = arith.constant dense<0xFF800000> : vector<32xf32>
    %72 = vector.multi_reduction <maximumf>, %71, %cst_24 [0] : vector<32x32xf32> to vector<32xf32>
    %73 = vector.shape_cast %72 : vector<32xf32> to vector<1x32xf32>
    %74 = vector.broadcast %73 : vector<1x32xf32> to vector<32x32xf32>
    %75 = arith.subf %71, %74 : vector<32x32xf32>
    %76 = math.exp %75 : vector<32x32xf32>
    %cst_25 = arith.constant dense<0.000000e+00> : vector<32xf32>
    %77 = vector.multi_reduction <add>, %76, %cst_25 [0] : vector<32x32xf32> to vector<32xf32>
    %78 = vector.shape_cast %77 : vector<32xf32> to vector<1x32xf32>
    %cst_26 = arith.constant dense<0.000000e+00> : vector<16x32xf32>
    %79 = tpu.matmul %69, %76, %cst_26 {dimension_numbers = #tpu.dot_dimension_numbers<[1], [0], [0], [1], [0, 0, 1, 1], [], []>} : vector<16x32xf32>, vector<32x32xf32>, vector<16x32xf32> -> vector<16x32xf32>
    %80 = tpu.reciprocal %78 {approx = true} : vector<1x32xf32> -> vector<1x32xf32>
    %81 = arith.mulf %78, %80 : vector<1x32xf32>
    %cst_27 = arith.constant 2.000000e+00 : f32
    %82 = vector.broadcast %cst_27 : f32 to vector<1x32xf32>
    %83 = arith.subf %82, %81 : vector<1x32xf32>
    %84 = arith.mulf %80, %83 : vector<1x32xf32>
    %85 = vector.broadcast %84 : vector<1x32xf32> to vector<16x32xf32>
    %86 = arith.mulf %79, %85 : vector<16x32xf32>
    %87 = tpu.concatenate %26, %46, %66, %86 in 0 : vector<16x32xf32>, vector<16x32xf32>, vector<16x32xf32>, vector<16x32xf32> -> vector<64x32xf32>
    %c0_28 = arith.constant 0 : index
    %c0_29 = arith.constant 0 : index
    %88 = vector.load %arg3[%c0_28, %c0_29] : memref<64x32xf32, #tpu.memory_space<vmem>>, vector<64x32xf32>
    %cst_30 = arith.constant dense<0.000000e+00> : vector<32x32xf32>
    %89 = tpu.matmul %87, %88, %cst_30 {dimension_numbers = #tpu.dot_dimension_numbers<[0], [0], [1], [1], [0, 1, 1, 1], [], []>} : vector<64x32xf32>, vector<64x32xf32>, vector<32x32xf32> -> vector<32x32xf32>
    %c0_31 = arith.constant 0 : index
    %c0_32 = arith.constant 0 : index
    %90 = vector.load %arg4[%c0_31, %c0_32] : memref<32x32xf32, #tpu.memory_space<vmem>>, vector<32x32xf32>
    %91 = arith.addf %89, %90 : vector<32x32xf32>
    %cst_33 = arith.constant dense<0.000000e+00> : vector<32xf32>
    %92 = vector.multi_reduction <add>, %91, %cst_33 [1] : vector<32x32xf32> to vector<32xf32>
    %93 = vector.shape_cast %92 : vector<32xf32> to vector<32x1xf32>
    %cst_34 = arith.constant 3.200000e+01 : f32
    %94 = vector.broadcast %cst_34 : f32 to vector<32x1xf32>
    %95 = arith.divf %93, %94 : vector<32x1xf32>
    %96 = vector.broadcast %95 : vector<32x1xf32> to vector<32x32xf32>
    %97 = arith.subf %91, %96 : vector<32x32xf32>
    %98 = arith.mulf %97, %97 : vector<32x32xf32>
    %cst_35 = arith.constant dense<0.000000e+00> : vector<32xf32>
    %99 = vector.multi_reduction <add>, %98, %cst_35 [1] : vector<32x32xf32> to vector<32xf32>
    %100 = vector.shape_cast %99 : vector<32xf32> to vector<32x1xf32>
    %cst_36 = arith.constant 3.200000e+01 : f32
    %101 = vector.broadcast %cst_36 : f32 to vector<32x1xf32>
    %102 = arith.divf %100, %101 : vector<32x1xf32>
    %103 = vector.broadcast %95 : vector<32x1xf32> to vector<32x32xf32>
    %104 = arith.subf %91, %103 : vector<32x32xf32>
    %cst_37 = arith.constant 9.99999974E-6 : f32
    %105 = vector.broadcast %cst_37 : f32 to vector<32x1xf32>
    %106 = arith.addf %102, %105 : vector<32x1xf32>
    %107 = math.rsqrt %106 : vector<32x1xf32>
    %108 = vector.broadcast %107 : vector<32x1xf32> to vector<32x32xf32>
    %109 = arith.mulf %104, %108 : vector<32x32xf32>
    %c0_38 = arith.constant 0 : index
    %c0_39 = arith.constant 0 : index
    %110 = vector.load %arg5[%c0_38, %c0_39] : memref<32x32xf32, #tpu.memory_space<vmem>>, vector<32x32xf32>
    %111 = arith.mulf %109, %110 : vector<32x32xf32>
    %c0_40 = arith.constant 0 : index
    %c0_41 = arith.constant 0 : index
    %112 = vector.load %arg6[%c0_40, %c0_41] : memref<32x32xf32, #tpu.memory_space<vmem>>, vector<32x32xf32>
    %113 = arith.addf %111, %112 : vector<32x32xf32>
    %114 = vector.shape_cast %113 : vector<32x32xf32> to vector<2x16x32xf32>
    %c0_42 = arith.constant 0 : index
    %c0_43 = arith.constant 0 : index
    %c0_44 = arith.constant 0 : index
    %115 = vector.load %arg10[%c0_42, %c0_43, %c0_44] : memref<2x16x32xf32, #tpu.memory_space<vmem>>, vector<2x16x32xf32>
    tpu.vector_store %arg10[%c0_42, %c0_43, %c0_44], %114 {strides = array<i32>} : memref<2x16x32xf32, #tpu.memory_space<vmem>>, vector<2x16x32xf32>,
    %116 = arith.mulf %113, %113 : vector<32x32xf32>
    %cst_45 = arith.constant dense<0.000000e+00> : vector<32xf32>
    %117 = vector.multi_reduction <add>, %116, %cst_45 [1] : vector<32x32xf32> to vector<32xf32>
    %118 = vector.shape_cast %117 : vector<32xf32> to vector<32x1xf32>
    %cst_46 = arith.constant 1.000000e-24 : f32
    %119 = vector.broadcast %cst_46 : f32 to vector<32x1xf32>
    %120 = arith.maximumf %118, %119 : vector<32x1xf32>
    %121 = math.rsqrt %120 : vector<32x1xf32>
    %122 = vector.broadcast %121 : vector<32x1xf32> to vector<32x32xf32>
    %123 = arith.mulf %113, %122 : vector<32x32xf32>
    %cst_47 = arith.constant dense<0.000000e+00> : vector<32x32xf32>
    %124 = tpu.matmul %123, %123, %cst_47 {dimension_numbers = #tpu.dot_dimension_numbers<[1], [1], [0], [0], [0, 0, 1, 0], [], []>} : vector<32x32xf32>, vector<32x32xf32>, vector<32x32xf32> -> vector<32x32xf32>
    %c0_48 = arith.constant 0 : index
    %c0_49 = arith.constant 0 : index
    %125 = vector.load %arg8[%c0_48, %c0_49] : memref<32x32xf32, #tpu.memory_space<vmem>>, vector<32x32xf32>
    %126 = arith.mulf %124, %125 : vector<32x32xf32>
    %cst_50 = arith.constant dense<0.000000e+00> : vector<32xf32>
    %127 = vector.multi_reduction <add>, %126, %cst_50 [1] : vector<32x32xf32> to vector<32xf32>
    %128 = vector.shape_cast %127 : vector<32xf32> to vector<32x1xf32>
    %c0_51 = arith.constant 0 : index
    %c0_52 = arith.constant 0 : index
    %129 = vector.load %arg9[%c0_51, %c0_52] : memref<32x2xf32, #tpu.memory_space<vmem>>, vector<32x2xf32>
    %130 = vector.broadcast %128 : vector<32x1xf32> to vector<32x2xf32>
    %131 = arith.mulf %130, %129 : vector<32x2xf32>
    %cst_53 = arith.constant dense<0.000000e+00> : vector<2xf32>
    %132 = vector.multi_reduction <add>, %131, %cst_53 [0] : vector<32x2xf32> to vector<2xf32>
    %133 = vector.shape_cast %132 : vector<2xf32> to vector<1x2xf32>
    %cst_54 = arith.constant 7.500000e-01 : f32
    %134 = vector.broadcast %cst_54 : f32 to vector<1x2xf32>
    %135 = arith.addf %133, %134 : vector<1x2xf32>
    %c0_55 = arith.constant 0 : index
    %c0_56 = arith.constant 0 : index
    %136 = vector.load %arg11[%c0_55, %c0_56] : memref<1x2xf32, #tpu.memory_space<vmem>>, vector<1x2xf32>
    tpu.vector_store %arg11[%c0_55, %c0_56], %135 {strides = array<i32>} : memref<1x2xf32, #tpu.memory_space<vmem>>, vector<1x2xf32>,
    return
  }
}

</mosaic_0001>

<bundles_post_ra>
// kernel: forward.1
= control target key start
LH: loop header
LB: loop body
LE: loop exit
PB: predicated region body
PF: predicated region fallthrough
CT: control target
= control target key end

     0   :  { %17 = vsyncpa [#allocation3], 0  ;;  %s2830_s0 = inlined_call_operand.vmem [shape: f32[2,16,32], index: 0, kind: input, shape index: {}]   ;;  %s2831_s1 = inlined_call_operand.hbm [shape: f32[128,32], index: 1, kind: input, shape index: {}]   ;;  %s2832_s2 = inlined_call_operand.vmem [shape: f32[128,32], index: 2, kind: input, shape index: {}]   ;;  %s2833_s3 = inlined_call_operand.hbm [shape: f32[64,32], index: 3, kind: input, shape index: {}]   ;;  %s2834_s4 = inlined_call_operand.hbm [shape: f32[32,32], index: 4, kind: input, shape index: {}]   ;;  %s2835_s5 = inlined_call_operand.vmem [shape: f32[32,32], index: 5, kind: input, shape index: {}]   ;;  %s2836_s6 = inlined_call_operand.vmem [shape: f32[32,32], index: 6, kind: input, shape index: {}]   ;;  %s2837_s7 = inlined_call_operand.hbm [shape: f32[32,32], index: 7, kind: input, shape index: {}]   ;;  %s2838_s8 = inlined_call_operand.hbm [shape: f32[32,32], index: 8, kind: input, shape index: {}]   ;;  %s2839_s9 = inlined_call_operand.vmem [shape: f32[32,2], index: 9, kind: input, shape index: {}]   ;;  %s2840_s10 = inlined_call_operand.hbm [shape: f32[2,16,32], index: 10, kind: output, shape index: {0}]   ;;  %s2841_s11 = inlined_call_operand.hbm [shape: f32[1,2], index: 11, kind: output, shape index: {1}]  }
   0x1   :  { %18 = vsyncpa [#allocation6], 0 }
   0x2   :  { %19 = vsyncpa [#allocation9], 0 }
   0x3   :  { %20 = vsyncpa [#allocation4], 0 }
   0x4   :  { %21 = vsyncpa [#allocation13], 0  ;;  %s2378_s17 = smov [#allocation5]   ;;  %s2379_s19 = smov [#allocation8]  }
   0x5   :  { %s43_s18 = sshll.u32 %s2378_s17, 4  ;;  %s71_s20 = sshll.u32 %s2379_s19, 4  ;;  %s44_s18 = int_to_ptr.vmem [resolvable:$true] %s43_s18  ;;  %s2447_s20 = int_to_ptr.vmem [resolvable:$true] %s71_s20 }
   0x6   :  { %s2214_s23 = scalar_lea.hbm %s2833_s3, 1024 }
   0x7   :  { %p2215_p0 = scmp.ne.s32.totalorder %s2833_s3, %s2214_s23  ;;  %p2218_p1 = scmp.lt.u32.totalorder %s2214_s23, %s2833_s3 }
   0x9   :  { %p2220_p2 = pnand %p2218_p1, %p2215_p0 }
   0xb   :  { %2223 = shalt.err (!%p2220_p2)
}
   0xc   :  { %s2224_s28 = scalar_lea.vmem %s44_s18, 1024  ;;  %p2229_p4 = scmp.lt.s32.totalorder %s44_s18, %s44_s18 }
   0xd   :  { %p2225_p3 = scmp.ne.s32.totalorder %s44_s18, %s2224_s28  ;;  %p2230_p5 = scmp.lt.s32.totalorder %s2224_s28, %s2224_s28 }
   0xf   :  { %p2231_p6 = por %p2230_p5, %p2229_p4 }
  0x11   :  { %p2232_p7 = pnand %p2231_p6, %p2225_p3 }
  0x13   :  { %2235 = shalt.err (!%p2232_p7)
}
  0x14   :  { %s2380_s29 = smov 128   ;;  %s2381_s30 = smov 8  }
  0x15   :  { %49 = dma.hbm_to_vmem [thread:$0]  %s2833_s3, 1024, %s44_s18, [#allocation6], %s2380_s29, %s2380_s29, %s2381_s30  }
  0x16   :  { %s2236_s16 = scalar_lea.hbm %s2837_s7, 512 }
  0x17   :  { %p2237_p8 = scmp.ne.s32.totalorder %s2837_s7, %s2236_s16  ;;  %p2240_p9 = scmp.lt.u32.totalorder %s2236_s16, %s2837_s7 }
  0x19   :  { %p2242_p10 = pnand %p2240_p9, %p2237_p8 }
  0x1b   :  { %2245 = shalt.err (!%p2242_p10)
}
  0x1c   :  { %s2246_s23 = scalar_lea.vmem %s2447_s20, 512  ;;  %p2251_p12 = scmp.lt.s32.totalorder %s2447_s20, %s2447_s20 }
  0x1d   :  { %p2247_p11 = scmp.ne.s32.totalorder %s2447_s20, %s2246_s23  ;;  %p2252_p13 = scmp.lt.s32.totalorder %s2246_s23, %s2246_s23 }
  0x1f   :  { %p2253_p0 = por %p2252_p13, %p2251_p12 }
  0x21   :  { %p2254_p1 = pnand %p2253_p0, %p2247_p11 }
  0x23   :  { %2257 = shalt.err (!%p2254_p1)
}
  0x24   :  { %77 = dma.hbm_to_vmem [thread:$0]  %s2837_s7, 512, %s2447_s20, [#allocation9], %s2380_s29, %s2380_s29, %s2381_s30  }
  0x25   :  { %s2382_s24 = smov [#allocation2]   ;;  %s2383_s26 = smov [#allocation7]  }
  0x26   :  { %s29_s25 = sshll.u32 %s2382_s24, 4  ;;  %s55_s27 = sshll.u32 %s2383_s26, 4  ;;  %s30_s25 = int_to_ptr.vmem [resolvable:$true] %s29_s25  ;;  %s2484_s27 = int_to_ptr.vmem [resolvable:$true] %s55_s27 }
  0x27   :  { %s2258_s13 = scalar_lea.hbm %s2831_s1, 2048 }
  0x28   :  { %p2259_p2 = scmp.ne.s32.totalorder %s2831_s1, %s2258_s13  ;;  %p2262_p3 = scmp.lt.u32.totalorder %s2258_s13, %s2831_s1 }
  0x2a   :  { %p2264_p4 = pnand %p2262_p3, %p2259_p2 }
  0x2c   :  { %2267 = shalt.err (!%p2264_p4)
}
  0x2d   :  { %s2268_s7 = scalar_lea.vmem %s30_s25, 2048  ;;  %p2273_p6 = scmp.lt.s32.totalorder %s30_s25, %s30_s25 }
  0x2e   :  { %p2269_p5 = scmp.ne.s32.totalorder %s30_s25, %s2268_s7  ;;  %p2274_p7 = scmp.lt.s32.totalorder %s2268_s7, %s2268_s7 }
  0x30   :  { %p2275_p8 = por %p2274_p7, %p2273_p6 }
  0x32   :  { %p2276_p9 = pnand %p2275_p8, %p2269_p5 }
  0x34   :  { %2279 = shalt.err (!%p2276_p9)
}
  0x35   :  { %35 = dma.hbm_to_vmem [thread:$0]  %s2831_s1, 2048, %s30_s25, [#allocation3], %s2380_s29, %s2380_s29, %s2381_s30  }
  0x36   :  { %s2280_s23 = scalar_lea.hbm %s2834_s4, 512 }
  0x37   :  { %p2281_p10 = scmp.ne.s32.totalorder %s2834_s4, %s2280_s23  ;;  %p2284_p11 = scmp.lt.u32.totalorder %s2280_s23, %s2834_s4 }
  0x39   :  { %p2286_p12 = pnand %p2284_p11, %p2281_p10 }
  0x3b   :  { %2289 = shalt.err (!%p2286_p12)
}
  0x3c   :  { %s2290_s28 = scalar_lea.vmem %s2484_s27, 512  ;;  %p2295_p0 = scmp.lt.s32.totalorder %s2484_s27, %s2484_s27 }
  0x3d   :  { %p2291_p13 = scmp.ne.s32.totalorder %s2484_s27, %s2290_s28  ;;  %p2296_p1 = scmp.lt.s32.totalorder %s2290_s28, %s2290_s28 }
  0x3f   :  { %p2297_p2 = por %p2296_p1, %p2295_p0 }
  0x41   :  { %p2298_p3 = pnand %p2297_p2, %p2291_p13 }
  0x43   :  { %2301 = shalt.err (!%p2298_p3)
}
  0x44   :  { %61 = dma.hbm_to_vmem [thread:$0]  %s2834_s4, 512, %s2484_s27, [#allocation6], %s2380_s29, %s2380_s29, %s2381_s30  }
  0x45   :  { %s2384_s12 = smov [#allocation10]   ;;  %s2302_s16 = scalar_lea.hbm %s2838_s8, 512 }
  0x46   :  { %s83_s13 = sshll.u32 %s2384_s12, 4  ;;  %p2303_p4 = scmp.ne.s32.totalorder %s2838_s8, %s2302_s16  ;;  %s84_s13 = int_to_ptr.vmem [resolvable:$true] %s83_s13 }
  0x47   :  { %p2306_p5 = scmp.lt.u32.totalorder %s2302_s16, %s2838_s8 }
  0x49   :  { %p2308_p6 = pnand %p2306_p5, %p2303_p4 }
  0x4b   :  { %2311 = shalt.err (!%p2308_p6)
}
  0x4c   :  { %s2312_s21 = scalar_lea.vmem %s84_s13, 512  ;;  %p2317_p8 = scmp.lt.s32.totalorder %s84_s13, %s84_s13 }
  0x4d   :  { %p2313_p7 = scmp.ne.s32.totalorder %s84_s13, %s2312_s21  ;;  %p2318_p9 = scmp.lt.s32.totalorder %s2312_s21, %s2312_s21 }
  0x4f   :  { %p2319_p10 = por %p2318_p9, %p2317_p8 }
  0x51   :  { %p2320_p11 = pnand %p2319_p10, %p2313_p7 }
  0x53   :  { %2323 = shalt.err (!%p2320_p11)
}
  0x54   :  { %89 = dma.hbm_to_vmem [thread:$0]  %s2838_s8, 512, %s84_s13, [#allocation9], %s2380_s29, %s2380_s29, %s2381_s30  }
  0x55   :  { %2368 = dma.done.wait [#allocation3], 2048  }
  0x56   :  { %2369 = vsyncadd [#allocation3], 4294965248 }
  0x57   :  { %2370 = dma.done.wait [#allocation6], 1536  }
  0x58   :  { %2371 = vsyncadd [#allocation6], 4294965760 }
  0x59   :  { %2372 = dma.done.wait [#allocation9], 1024  }
  0x5a   :  { %2373 = vsyncadd [#allocation9], 4294966272  ;;  %vm143_vm0 = vcmask 261120   ;;  %v107_v1 = vld [vmem:[%s2830_s0] sm:$0xff]  ;;  %v108_v2 = vld [vmem:[%s2830_s0 + $0x8] sm:$0xff]  ;;  %vm385_vm2 = vcmask 64512  }
  0x5b   :  { %vm2538_vm1 = vmpackc.low %vm143_vm0, %vm143_vm0  ;;  %v109_v3 = vld [vmem:[%s2830_s0 + $0x10] sm:$0xff]  ;;  %v2072_v4 = vpack.c.bf16 %v108_v2, %v107_v1  ;;  %v110_v5 = vld [vmem:[%s2830_s0 + $0x18] sm:$0xff]  ;;  %vm1414_vm3 = vcmask 523264  }
  0x5c   :  { %v111_v6 = vld [vmem:[#allocation2] sm:$0xff]  ;;  %v2078_v7 = vpack.c.bf16 %v110_v5, %v109_v3  ;;  %v112_v8 = vld [vmem:[#allocation2 + $0x8] sm:$0xff]  ;;  %v113_v9 = vld [vmem:[#allocation2 + $0x10] sm:$0xff] }
  0x5d   :  { %1936 = vmatprep.mubr.msk.f32.mxu0 %vm143_vm0, %v111_v6  ;;  %2074 = vmatprep.subr.msk.bf16.mxu0 %vm2538_vm1, %v2072_v4  ;;  %v114_v10 = vld [vmem:[#allocation2 + $0x18] sm:$0xff]  ;;  %v115_v11 = vld [vmem:[#allocation2 + $0x20] sm:$0xff]  ;;  %v116_v12 = vld [vmem:[#allocation2 + $0x28] sm:$0xff] }
  0x5e   :  { %2077 = vmatpush3.bf16.xpose.msk.msra.mxu0 %vm2538_vm1, %v2072_v4  ;;  %v127_v13 = vld [vmem:[%s2832_s2] sm:$0xff]  ;;  %v132_v23 = vld [vmem:[%s2832_s2 + $0x28] sm:$0xff]  ;;  %v117_v25 = vld [vmem:[#allocation2 + $0x30] sm:$0xff] }
  0x5f   :  { %2080 = vmatprep.subr.msk.bf16.mxu0 %vm2538_vm1, %v2078_v7  ;;  %v131_v19 = vld [vmem:[%s2832_s2 + $0x20] sm:$0xff]  ;;  %v118_v26 = vld [vmem:[#allocation2 + $0x38] sm:$0xff]  ;;  %v120_v28 = vld [vmem:[#allocation2 + $0x48] sm:$0xff] }
  0x60   :  { %v119_v27 = vld [vmem:[#allocation2 + $0x40] sm:$0xff]  ;;  %v133_v35 = vld [vmem:[%s2832_s2 + $0x30] sm:$0xff]  ;;  %v134_v37 = vld [vmem:[%s2832_s2 + $0x38] sm:$0xff] }
  0x61   :  { %v135_v41 = vld [vmem:[%s2832_s2 + $0x40] sm:$0xff]  ;;  %v121_v43 = vld [vmem:[#allocation2 + $0x50] sm:$0xff]  ;;  %v122_v44 = vld [vmem:[#allocation2 + $0x58] sm:$0xff] }
  0x62   :  { %v2605_v45 = vld [vmem:[#allocation8 + $0x8] sm:$0xff]  ;;  %v2607_v46 = vld [vmem:[#allocation8] sm:$0xff]  ;;  %v2613_v54 = vld [vmem:[#allocation8 + $0x18] sm:$0xff] }
  0x63   :  { %v2615_v55 = vld [vmem:[#allocation8 + $0x10] sm:$0xff] }
  0x66   :  { %2083 = vmatpush3.bf16.xpose.msk.msra.mxu0 %vm2538_vm1, %v2078_v7 }
  0x6d   :  { %1937 = vmatmul.mubr.msk.f32.vlgmr.msra.gmra.mrb[0].mxu0 %vm143_vm0, %v112_v8 }
  0x6e   :  { %1939 = vmatprep.mubr.msk.f32.mxu0 %vm143_vm0, %v113_v9 }
  0x71   :  { %1940 = vmatmul.mubr.msk.f32.gmra.mrb[2].mxu0 %vm143_vm0, %v114_v10 }
  0x72   :  { %1942 = vmatprep.mubr.msk.f32.mxu0 %vm143_vm0, %v115_v11 }
  0x75   :  { %1943 = vmatmul.mubr.msk.f32.gmra.mrb[4].mxu0 %vm143_vm0, %v116_v12 }
  0x76   :  { %1945 = vmatprep.mubr.msk.f32.mxu0 %vm143_vm0, %v117_v25 }
  0x79   :  { %1946 = vmatmul.mubr.msk.f32.gmra.mrb[6].mxu0 %vm143_vm0, %v118_v26 }
  0x7a   :  { %1948 = vmatprep.mubr.msk.f32.mxu0 %vm143_vm0, %v119_v27 }
  0x7d   :  { %1949 = vmatmul.mubr.msk.f32.gmra.mrb[8].mxu0 %vm143_vm0, %v120_v28 }
  0x7e   :  { %1951 = vmatprep.mubr.msk.f32.mxu0 %vm143_vm0, %v121_v43  ;;  %v124_v43 = vld [vmem:[#allocation2 + $0x68] sm:$0xff] }
  0x81   :  { %1952 = vmatmul.mubr.msk.f32.gmra.mrb[10].mxu0 %vm143_vm0, %v122_v44 }
 0x140   :  { %v2571_v14 = vpop.f32.mrb[0].mxu0 }
 0x141   :  { %v270_v15 = vpop.f32.mrb[1].mxu0 }
 0x142   :  { %v271_v16 = vadd.f32 %v270_v15, %v127_v13 }
 0x144   :  { %v2573_v17 = vpop.f32.mrb[2].mxu0  ;;  %1960 = vmatprep.subr.mxu1 %v271_v16 }
 0x145   :  { %v2575_v18 = vpop.f32.mrb[3].mxu0  ;;  %1961 = vmatpush3.msra.mxu1 %v271_v16 }
 0x148   :  { %v1944_v20 = vpop.f32.mrb[4].mxu0 }
 0x149   :  { %v290_v21 = vpop.f32.mrb[5].mxu0  ;;  %v296_v24 = vadd.f32 %v1944_v20, %v132_v23 }
 0x14a   :  { %v291_v22 = vadd.f32 %v290_v21, %v131_v19 }
 0x14c   :  { %353 = vxpose.xlu0.b32.start.end [1/1] (short) (narrow) %v291_v22, 32  ;;  %v1947_v33 = vpop.f32.mrb[6].mxu0 }
 0x14d   :  { %v300_v34 = vpop.f32.mrb[7].mxu0  ;;  %v306_v38 = vadd.f32 %v1947_v33, %v134_v37  ;;  %v136_v33 = vld [vmem:[%s2832_s2 + $0x48] sm:$0xff] }
 0x14e   :  { %v301_v36 = vadd.f32 %v300_v34, %v133_v35 }
 0x150   :  { %862 = vxpose.xlu1.b32.start.end [1/1] (short) (narrow) %v301_v36, 32  ;;  %v2597_v39 = vpop.f32.mrb[8].mxu0 }
 0x151   :  { %v310_v40 = vpop.f32.mrb[9].mxu0  ;;  %v316_v36 = vadd.f32 %v2597_v39, %v136_v33  ;;  %v137_v39 = vld [vmem:[%s2832_s2 + $0x50] sm:$0xff] }
 0x152   :  { %v311_v42 = vadd.f32 %v310_v40, %v135_v41 }
 0x154   :  { %v2638_v40 = vpop.f32.mrb[10].mxu0 }
 0x159   :  { %608 = vxpose.xlu0.b32.start.end [1/1] (short) (narrow) %v296_v24, 32 }
 0x15d   :  { %1116 = vxpose.xlu1.b32.start.end [1/1] (short) (narrow) %v306_v38, 32 }
 0x1cc   :  { %v369_v29 = vpop.trf.xlu0 }
 0x1cd   :  { %1962 = vmatprep.mubr.msk.f32.mxu1 %vm385_vm2, %v369_v29  ;;  %v128_v29 = vld [vmem:[%s2832_s2 + $0x8] sm:$0xff] }
 0x1ce   :  { %v276_v35 = vadd.f32 %v2571_v14, %v128_v29  ;;  %v320_v14 = vpop.f32.mrb[11].mxu0 }
 0x1cf   :  { %v321_v41 = vadd.f32 %v320_v14, %v137_v39 }
 0x1d0   :  { %v370_v30 = vpop.trf.xlu0 }
 0x1d1   :  { %1963 = vmatmul.mubr.msk.f32.vlgmr.msra.gmra.mrb[0].mxu1 %vm385_vm2, %v370_v30 }
 0x1d4   :  { %v371_v31 = vpop.trf.xlu0 }
 0x1d5   :  { %1965 = vmatprep.mubr.msk.f32.mxu1 %vm385_vm2, %v371_v31 }
 0x1d8   :  { %v372_v32 = vpop.trf.xlu0 }
 0x1d9   :  { %1966 = vmatmul.mubr.msk.f32.gmra.mrb[2].mxu1 %vm385_vm2, %v372_v32 }
 0x1da   :  { %1976 = vmatprep.mubr.msk.f32.mxu1 %vm143_vm0, %v311_v42  ;;  %v123_v42 = vld [vmem:[#allocation2 + $0x60] sm:$0xff] }
 0x1db   :  { %1954 = vmatprep.mubr.msk.f32.mxu0 %vm143_vm0, %v123_v42  ;;  %v129_v42 = vld [vmem:[%s2832_s2 + $0x10] sm:$0xff] }
 0x1dc   :  { %v624_v19 = vpop.trf.xlu0  ;;  %1955 = vmatmul.mubr.msk.f32.gmra.mrb[12].mxu0 %vm143_vm0, %v124_v43 }
 0x1e0   :  { %v625_v30 = vpop.trf.xlu0 }
 0x1e4   :  { %v626_v37 = vpop.trf.xlu0 }
 0x1e8   :  { %v627_v38 = vpop.trf.xlu0 }
 0x2a4   :  { %v1964_v47 = vpop.f32.mrb[0].mxu1 }
 0x2a5   :  { %v470_v48 = vadd.f32 %v1964_v47, %v2605_v45  ;;  %v464_v49 = vpop.f32.mrb[1].mxu1 }
 0x2a6   :  { %v465_v50 = vadd.f32 %v464_v49, %v2607_v46 }
 0x2a7   :  { %v484_v51 = vsel %vm143_vm0, %v470_v48, -inf }
 0x2a8   :  { %v483_v52 = vsel %vm143_vm0, %v465_v50, -inf }
 0x2a9   :  { %v487_v53 = vmax.f32 %v483_v52, %v484_v51 }
 0x2ac   :  { %v1967_v56 = vpop.f32.mrb[2].mxu1 }
 0x2ad   :  { %v480_v57 = vadd.f32 %v1967_v56, %v2613_v54  ;;  %v474_v58 = vpop.f32.mrb[3].mxu1 }
 0x2ae   :  { %v475_v59 = vadd.f32 %v474_v58, %v2615_v55 }
 0x2af   :  { %v486_v60 = vsel %vm143_vm0, %v480_v57, -inf }
 0x2b0   :  { %v485_v61 = vsel %vm143_vm0, %v475_v59, -inf }
 0x2b1   :  { %v488_v62 = vmax.f32 %v485_v61, %v486_v60 }
 0x2b3   :  { %v489_v63 = vmax.f32 %v487_v53, %v488_v62 }
 0x2b5   :  { %v490_v1 = vrot.slane %v489_v63, 4 }
 0x2b7   :  { %v491_v2 = vmax.f32 %v489_v63, %v490_v1 }
 0x2b9   :  { %v492_v3 = vrot.slane %v491_v2, 2 }
 0x2bb   :  { %v493_v4 = vmax.f32 %v491_v2, %v492_v3 }
 0x2bd   :  { %v494_v5 = vrot.slane %v493_v4, 1 }
 0x2bf   :  { %v495_v6 = vmax.f32 %v493_v4, %v494_v5 }
 0x2c1   :  { %v498_v7 = vsub.f32 %v475_v59, %v495_v6  ;;  %v496_v8 = vsub.f32 %v465_v50, %v495_v6  ;;  %v497_v9 = vsub.f32 %v470_v48, %v495_v6  ;;  %v499_v10 = vsub.f32 %v480_v57, %v495_v6 }
 0x2c3   :  { %v504_v11 = vmul.f32 1.442695, %v498_v7  ;;  %v500_v12 = vmul.f32 1.442695, %v496_v8  ;;  %v502_v13 = vmul.f32 1.442695, %v497_v9 }
 0x2c4   :  { %v506_v15 = vmul.f32 1.442695, %v499_v10 }
 0x2c5   :  { %2158 = vpow2.f32 %v504_v11 }
 0x2c6   :  { %2160 = vpow2.f32 %v500_v12 }
 0x2c7   :  { %2162 = vpow2.f32 %v502_v13 }
 0x2c8   :  { %2164 = vpow2.f32 %v506_v15 }
 0x2cf   :  { %v2159_v16 = vpop.eup %2158 }
 0x2d0   :  { %v2161_v20 = vpop.eup %2160  ;;  %v511_v28 = vsel %vm143_vm0, %v2159_v16, 0.0 }
 0x2d1   :  { %v2163_v21 = vpop.eup %2162  ;;  %v508_v22 = vsel %vm143_vm0, %v2161_v20, 0.0 }
 0x2d2   :  { %v2165_v23 = vpop.eup %2164  ;;  %v2084_v24 = vpack.c.bf16 %v2163_v21, %v2161_v20  ;;  %v509_v25 = vsel %vm143_vm0, %v2163_v21, 0.0 }
 0x2d3   :  { %v2088_v26 = vpack.c.bf16 %v2165_v23, %v2159_v16  ;;  %v510_v27 = vadd.f32 %v509_v25, %v508_v22  ;;  %v513_v32 = vsel %vm143_vm0, %v2165_v23, 0.0 }
 0x2d4   :  { %2085 = vmatprep.subr.bf16.mxu1 %v2084_v24 }
 0x2d5   :  { %2087 = vmatpush3.bf16.msra.mxu1 %v2084_v24  ;;  %v512_v31 = vadd.f32 %v511_v28, %v510_v27 }
 0x2d6   :  { %2089 = vmatprep.subr.bf16.mxu1 %v2088_v26 }
 0x2d7   :  { %v514_v34 = vadd.f32 %v513_v32, %v512_v31  ;;  %v878_v32 = vpop.trf.xlu1 }
 0x2d9   :  { %2091 = vmatpush3.bf16.msra.mxu1 %v2088_v26  ;;  %v515_v44 = vrot.slane %v514_v34, 4 }
 0x2da   :  { %1979 = vmatprep.subr.mxu1 %v276_v35 }
 0x2db   :  { %v516_v47 = vadd.f32 %v515_v44, %v514_v34  ;;  %v879_v43 = vpop.trf.xlu1 }
 0x2dc   :  { %1977 = vmatmul.mubr.msk.f32.vlgmr.msra.gmra.mrb[4].mxu1 %vm143_vm0, %v316_v36 }
 0x2dd   :  { %1980 = vmatpush3.msra.mxu1 %v276_v35  ;;  %1981 = vmatprep.mubr.msk.f32.mxu1 %vm385_vm2, %v624_v19  ;;  %v517_v48 = vrot.slane %v516_v47, 2 }
 0x2df   :  { %v518_v49 = vadd.f32 %v517_v48, %v516_v47  ;;  %v138_v48 = vld [vmem:[%s2832_s2 + $0x58] sm:$0xff] }
 0x2e0   :  { %1982 = vmatmul.mubr.msk.f32.vlgmr.msra.gmra.mrb[6].mxu1 %vm385_vm2, %v625_v30 }
 0x2e1   :  { %1984 = vmatprep.mubr.msk.f32.mxu1 %vm385_vm2, %v626_v37  ;;  %v519_v50 = vrot.slane %v518_v49, 1 }
 0x2e3   :  { %v520_v51 = vadd.f32 %v519_v50, %v518_v49  ;;  %v281_v50 = vadd.f32 %v2575_v18, %v129_v42 }
 0x2e4   :  { %1985 = vmatmul.mubr.msk.f32.gmra.mrb[8].mxu1 %vm385_vm2, %v627_v38 }
 0x2e5   :  { %1995 = vmatprep.mubr.msk.f32.mxu1 %vm143_vm0, %v321_v41  ;;  %2166 = vrcp.f32 %v520_v51 }
 0x2ef   :  { %v2167_v52 = vpop.eup %2166 }
 0x2f0   :  { %v603_v53 = vmul.f32 %v2167_v52, %v520_v51  ;;  %v326_v51 = vadd.f32 %v2638_v40, %v138_v48  ;;  %v139_v40 = vld [vmem:[%s2832_s2 + $0x60] sm:$0xff] }
 0x2f2   :  { %v604_v56 = vsub.f32 2.0, %v603_v53 }
 0x2f4   :  { %v605_v57 = vmul.f32 %v2167_v52, %v604_v56  ;;  %v880_v52 = vpop.trf.xlu1  ;;  %v2671_v56 = vpop.f32.mrb[12].mxu0 }
 0x2f5   :  { %v330_v18 = vpop.f32.mrb[13].mxu0 }
 0x2f8   :  { %v881_v53 = vpop.trf.xlu1 }
 0x3af   :  { %v1978_v58 = vpop.f32.mrb[4].mxu1 }
 0x3b0   :  { %v607_v59 = vmul.f32 %v1978_v58, %v605_v57  ;;  %v593_v60 = vpop.f32.mrb[5].mxu1  ;;  %v125_v58 = vld [vmem:[#allocation2 + $0x70] sm:$0xff] }
 0x3b1   :  { %v606_v61 = vmul.f32 %v605_v57, %v593_v60  ;;  %v331_v57 = vadd.f32 %v330_v18, %v139_v40  ;;  %1957 = vmatprep.mubr.msk.f32.mxu0 %vm143_vm0, %v125_v58 }
 0x3b3   :  { %v1983_v62 = vpop.f32.mrb[6].mxu1  ;;  %1382 = vxpose.xlu0.b32.start [1/8] (short) (narrow) %v606_v61, 32 }
 0x3b4   :  { %v724_v63 = vadd.f32 %v1983_v62, %v2605_v45  ;;  %v718_v1 = vpop.f32.mrb[7].mxu1 }
 0x3b5   :  { %v719_v2 = vadd.f32 %v718_v1, %v2607_v46 }
 0x3b6   :  { %v738_v3 = vsel %vm143_vm0, %v724_v63, -inf }
 0x3b7   :  { %v737_v4 = vsel %vm143_vm0, %v719_v2, -inf  ;;  %v1986_v5 = vpop.f32.mrb[8].mxu1  ;;  %1383 = vxpose.xlu0.b32.cont [2/8] (short) (narrow) %v607_v59, 32  ;;  %v126_v59 = vld [vmem:[#allocation2 + $0x78] sm:$0xff] }
 0x3b8   :  { %v741_v6 = vmax.f32 %v737_v4, %v738_v3  ;;  %v734_v7 = vadd.f32 %v1986_v5, %v2613_v54  ;;  %v728_v8 = vpop.f32.mrb[9].mxu1  ;;  %1958 = vmatmul.mubr.msk.f32.gmra.mrb[14].mxu0 %vm143_vm0, %v126_v59 }
 0x3b9   :  { %v729_v9 = vadd.f32 %v728_v8, %v2615_v55 }
 0x3ba   :  { %v740_v10 = vsel %vm143_vm0, %v734_v7, -inf }
 0x3bb   :  { %v739_v11 = vsel %vm143_vm0, %v729_v9, -inf }
 0x3bc   :  { %v742_v12 = vmax.f32 %v739_v11, %v740_v10 }
 0x3be   :  { %v743_v13 = vmax.f32 %v741_v6, %v742_v12 }
 0x3c0   :  { %v744_v15 = vrot.slane %v743_v13, 4 }
 0x3c2   :  { %v745_v16 = vmax.f32 %v743_v13, %v744_v15 }
 0x3c4   :  { %v746_v19 = vrot.slane %v745_v16, 2 }
 0x3c6   :  { %v747_v20 = vmax.f32 %v745_v16, %v746_v19 }
 0x3c8   :  { %v748_v21 = vrot.slane %v747_v20, 1 }
 0x3ca   :  { %v749_v22 = vmax.f32 %v747_v20, %v748_v21 }
 0x3cc   :  { %v752_v23 = vsub.f32 %v729_v9, %v749_v22  ;;  %v750_v24 = vsub.f32 %v719_v2, %v749_v22  ;;  %v751_v25 = vsub.f32 %v724_v63, %v749_v22  ;;  %v753_v26 = vsub.f32 %v734_v7, %v749_v22 }
 0x3ce   :  { %v758_v27 = vmul.f32 1.442695, %v752_v23  ;;  %v754_v28 = vmul.f32 1.442695, %v750_v24  ;;  %v756_v29 = vmul.f32 1.442695, %v751_v25 }
 0x3cf   :  { %v760_v30 = vmul.f32 1.442695, %v753_v26 }
 0x3d0   :  { %2168 = vpow2.f32 %v758_v27 }
 0x3d1   :  { %2170 = vpow2.f32 %v754_v28 }
 0x3d2   :  { %2172 = vpow2.f32 %v756_v29 }
 0x3d3   :  { %2174 = vpow2.f32 %v760_v30 }
 0x3da   :  { %v2169_v31 = vpop.eup %2168 }
 0x3db   :  { %v2171_v33 = vpop.eup %2170  ;;  %v765_v41 = vsel %vm143_vm0, %v2169_v31, 0.0 }
 0x3dc   :  { %v2173_v34 = vpop.eup %2172  ;;  %v762_v35 = vsel %vm143_vm0, %v2171_v33, 0.0 }
 0x3dd   :  { %v2175_v36 = vpop.eup %2174  ;;  %v2092_v37 = vpack.c.bf16 %v2173_v34, %v2171_v33  ;;  %v763_v38 = vsel %vm143_vm0, %v2173_v34, 0.0 }
 0x3de   :  { %v2096_v14 = vpack.c.bf16 %v2175_v36, %v2169_v31  ;;  %v764_v39 = vadd.f32 %v763_v38, %v762_v35  ;;  %v767_v47 = vsel %vm143_vm0, %v2175_v36, 0.0 }
 0x3df   :  { %2093 = vmatprep.subr.bf16.mxu1 %v2092_v37 }
 0x3e0   :  { %2095 = vmatpush3.bf16.msra.mxu1 %v2092_v37  ;;  %v766_v44 = vadd.f32 %v765_v41, %v764_v39 }
 0x3e1   :  { %2097 = vmatprep.subr.bf16.mxu1 %v2096_v14 }
 0x3e2   :  { %v768_v49 = vadd.f32 %v767_v47, %v766_v44  ;;  %v1132_v44 = vpop.trf.xlu1 }
 0x3e4   :  { %2099 = vmatpush3.bf16.msra.mxu1 %v2096_v14  ;;  %v769_v60 = vrot.slane %v768_v49, 4 }
 0x3e5   :  { %1998 = vmatprep.subr.mxu1 %v281_v50 }
 0x3e6   :  { %v770_v61 = vadd.f32 %v769_v60, %v768_v49  ;;  %v1133_v58 = vpop.trf.xlu1 }
 0x3e7   :  { %1996 = vmatmul.mubr.msk.f32.vlgmr.msra.gmra.mrb[10].mxu1 %vm143_vm0, %v326_v51 }
 0x3e8   :  { %1999 = vmatpush3.msra.mxu1 %v281_v50  ;;  %2000 = vmatprep.mubr.msk.f32.mxu1 %vm385_vm2, %v878_v32  ;;  %v771_v62 = vrot.slane %v770_v61, 2 }
 0x3ea   :  { %v772_v63 = vadd.f32 %v771_v62, %v770_v61  ;;  %v140_v61 = vld [vmem:[%s2832_s2 + $0x68] sm:$0xff] }
 0x3eb   :  { %2001 = vmatmul.mubr.msk.f32.vlgmr.msra.gmra.mrb[12].mxu1 %vm385_vm2, %v879_v43 }
 0x3ec   :  { %2003 = vmatprep.mubr.msk.f32.mxu1 %vm385_vm2, %v880_v52  ;;  %v773_v1 = vrot.slane %v772_v63, 1 }
 0x3ee   :  { %v774_v2 = vadd.f32 %v773_v1, %v772_v63  ;;  %v336_v1 = vadd.f32 %v2671_v56, %v140_v61 }
 0x3ef   :  { %2004 = vmatmul.mubr.msk.f32.gmra.mrb[14].mxu1 %vm385_vm2, %v881_v53 }
 0x3f0   :  { %2014 = vmatprep.mubr.msk.f32.mxu1 %vm143_vm0, %v331_v57  ;;  %2176 = vrcp.f32 %v774_v2  ;;  %v130_v57 = vld [vmem:[%s2832_s2 + $0x18] sm:$0xff] }
 0x3f1   :  { %v286_v63 = vadd.f32 %v2573_v17, %v130_v57  ;;  %v141_v17 = vld [vmem:[%s2832_s2 + $0x70] sm:$0xff] }
 0x3fa   :  { %v2177_v3 = vpop.eup %2176 }
 0x3fb   :  { %v857_v4 = vmul.f32 %v2177_v3, %v774_v2  ;;  %v1134_v2 = vpop.trf.xlu1 }
 0x3fd   :  { %v858_v5 = vsub.f32 2.0, %v857_v4 }
 0x3ff   :  { %v859_v6 = vmul.f32 %v2177_v3, %v858_v5  ;;  %v1135_v3 = vpop.trf.xlu1 }
 0x48b   :  { %v2704_v4 = vpop.f32.mrb[14].mxu0 }
 0x48c   :  { %v340_v56 = vpop.f32.mrb[15].mxu0 }
 0x48d   :  { %v341_v5 = vadd.f32 %v340_v56, %v141_v17  ;;  %v1371_v17 = vld [vmem:[#allocation5 + $0x8] sm:$0xff]  ;;  %v1372_v56 = vld [vmem:[#allocation5 + $0x10] sm:$0xff] }
 0x4ba   :  { %v1997_v7 = vpop.f32.mrb[10].mxu1 }
 0x4bb   :  { %v861_v8 = vmul.f32 %v1997_v7, %v859_v6  ;;  %v847_v9 = vpop.f32.mrb[11].mxu1 }
 0x4bc   :  { %v860_v10 = vmul.f32 %v859_v6, %v847_v9 }
 0x4be   :  { %v2002_v11 = vpop.f32.mrb[12].mxu1  ;;  %1384 = vxpose.xlu0.b32.cont [3/8] (short) (narrow) %v860_v10, 32 }
 0x4bf   :  { %v978_v12 = vadd.f32 %v2002_v11, %v2605_v45  ;;  %v972_v13 = vpop.f32.mrb[13].mxu1 }
 0x4c0   :  { %v973_v15 = vadd.f32 %v972_v13, %v2607_v46 }
 0x4c1   :  { %v992_v16 = vsel %vm143_vm0, %v978_v12, -inf }
 0x4c2   :  { %v991_v19 = vsel %vm143_vm0, %v973_v15, -inf  ;;  %v2005_v20 = vpop.f32.mrb[14].mxu1  ;;  %1385 = vxpose.xlu0.b32.cont [4/8] (short) (narrow) %v861_v8, 32 }
 0x4c3   :  { %v995_v21 = vmax.f32 %v991_v19, %v992_v16  ;;  %v988_v22 = vadd.f32 %v2005_v20, %v2613_v54  ;;  %v982_v23 = vpop.f32.mrb[15].mxu1 }
 0x4c4   :  { %v983_v24 = vadd.f32 %v982_v23, %v2615_v55 }
 0x4c5   :  { %v994_v25 = vsel %vm143_vm0, %v988_v22, -inf }
 0x4c6   :  { %v993_v26 = vsel %vm143_vm0, %v983_v24, -inf }
 0x4c7   :  { %v996_v27 = vmax.f32 %v993_v26, %v994_v25 }
 0x4c9   :  { %v997_v28 = vmax.f32 %v995_v21, %v996_v27 }
 0x4cb   :  { %v998_v29 = vrot.slane %v997_v28, 4 }
 0x4cd   :  { %v999_v30 = vmax.f32 %v997_v28, %v998_v29 }
 0x4cf   :  { %v1000_v31 = vrot.slane %v999_v30, 2 }
 0x4d1   :  { %v1001_v32 = vmax.f32 %v999_v30, %v1000_v31 }
 0x4d3   :  { %v1002_v33 = vrot.slane %v1001_v32, 1 }
 0x4d5   :  { %v1003_v34 = vmax.f32 %v1001_v32, %v1002_v33 }
 0x4d7   :  { %v1006_v35 = vsub.f32 %v983_v24, %v1003_v34  ;;  %v1004_v36 = vsub.f32 %v973_v15, %v1003_v34  ;;  %v1005_v37 = vsub.f32 %v978_v12, %v1003_v34  ;;  %v1007_v38 = vsub.f32 %v988_v22, %v1003_v34 }
 0x4d9   :  { %v1012_v14 = vmul.f32 1.442695, %v1006_v35  ;;  %v1008_v39 = vmul.f32 1.442695, %v1004_v36  ;;  %v1010_v41 = vmul.f32 1.442695, %v1005_v37 }
 0x4da   :  { %v1014_v42 = vmul.f32 1.442695, %v1007_v38 }
 0x4db   :  { %2178 = vpow2.f32 %v1012_v14 }
 0x4dc   :  { %2180 = vpow2.f32 %v1008_v39 }
 0x4dd   :  { %2182 = vpow2.f32 %v1010_v41 }
 0x4de   :  { %2184 = vpow2.f32 %v1014_v42 }
 0x4e5   :  { %v2179_v43 = vpop.eup %2178 }
 0x4e6   :  { %v2181_v47 = vpop.eup %2180  ;;  %v1019_v40 = vsel %vm143_vm0, %v2179_v43, 0.0 }
 0x4e7   :  { %v2183_v48 = vpop.eup %2182  ;;  %v1016_v49 = vsel %vm143_vm0, %v2181_v47, 0.0 }
 0x4e8   :  { %v2185_v50 = vpop.eup %2184  ;;  %v2100_v51 = vpack.c.bf16 %v2183_v48, %v2181_v47  ;;  %v1017_v52 = vsel %vm143_vm0, %v2183_v48, 0.0 }
 0x4e9   :  { %v2104_v53 = vpack.c.bf16 %v2185_v50, %v2179_v43  ;;  %v1018_v18 = vadd.f32 %v1017_v52, %v1016_v49  ;;  %v1021_v60 = vsel %vm143_vm0, %v2185_v50, 0.0 }
 0x4ea   :  { %2101 = vmatprep.subr.bf16.mxu1 %v2100_v51 }
 0x4eb   :  { %2103 = vmatpush3.bf16.msra.mxu1 %v2100_v51  ;;  %v1020_v59 = vadd.f32 %v1019_v40, %v1018_v18 }
 0x4ec   :  { %2105 = vmatprep.subr.bf16.mxu1 %v2104_v53 }
 0x4ed   :  { %v1022_v62 = vadd.f32 %v1021_v60, %v1020_v59 }
 0x4ef   :  { %2107 = vmatpush3.bf16.msra.mxu1 %v2104_v53  ;;  %v1023_v6 = vrot.slane %v1022_v62, 4 }
 0x4f0   :  { %2017 = vmatprep.subr.mxu1 %v286_v63 }
 0x4f1   :  { %v1024_v7 = vadd.f32 %v1023_v6, %v1022_v62  ;;  %v1373_v6 = vld [vmem:[#allocation5 + $0x18] sm:$0xff] }
 0x4f2   :  { %2015 = vmatmul.mubr.msk.f32.vlgmr.msra.gmra.mrb[16].mxu1 %vm143_vm0, %v336_v1 }
 0x4f3   :  { %2018 = vmatpush3.msra.mxu1 %v286_v63  ;;  %2019 = vmatprep.mubr.msk.f32.mxu1 %vm385_vm2, %v1132_v44  ;;  %v1025_v8 = vrot.slane %v1024_v7, 2  ;;  %v142_v63 = vld [vmem:[%s2832_s2 + $0x78] sm:$0xff] }
 0x4f5   :  { %v1026_v9 = vadd.f32 %v1025_v8, %v1024_v7  ;;  %v2120_v7 = vpack.c.bf16 %v1373_v6, %v1372_v56  ;;  %v1374_v8 = vld [vmem:[#allocation5 + $0x20] sm:$0xff] }
 0x4f6   :  { %2020 = vmatmul.mubr.msk.f32.vlgmr.msra.gmra.mrb[18].mxu1 %vm385_vm2, %v1133_v58 }
 0x4f7   :  { %2022 = vmatprep.mubr.msk.f32.mxu1 %vm385_vm2, %v1134_v2  ;;  %v1027_v10 = vrot.slane %v1026_v9, 1  ;;  %v346_v2 = vadd.f32 %v2704_v4, %v142_v63 }
 0x4f9   :  { %v1028_v11 = vadd.f32 %v1027_v10, %v1026_v9  ;;  %v1375_v9 = vld [vmem:[#allocation5 + $0x28] sm:$0xff] }
 0x4fa   :  { %2023 = vmatmul.mubr.msk.f32.gmra.mrb[20].mxu1 %vm385_vm2, %v1135_v3  ;;  %v1370_v3 = vld [vmem:[#allocation5] sm:$0xff]  ;;  %v2124_v10 = vpack.c.bf16 %v1375_v9, %v1374_v8 }
 0x4fb   :  { %2033 = vmatprep.mubr.msk.f32.mxu1 %vm143_vm0, %v341_v5  ;;  %2186 = vrcp.f32 %v1028_v11  ;;  %v2116_v5 = vpack.c.bf16 %v1371_v17, %v1370_v3 }
 0x4fd   :  { %2117 = vmatprep.subr.bf16.mxu0 %v2116_v5 }
 0x4fe   :  { %2119 = vmatpush3.bf16.msra.mxu0 %v2116_v5 }
 0x4ff   :  { %2121 = vmatprep.subr.bf16.mxu0 %v2120_v7 }
 0x502   :  { %2123 = vmatpush3.bf16.msra.mxu0 %v2120_v7 }
 0x503   :  { %2125 = vmatprep.subr.bf16.mxu0 %v2124_v10 }
 0x505   :  { %v2187_v12 = vpop.eup %2186 }
 0x506   :  { %v1111_v13 = vmul.f32 %v2187_v12, %v1028_v11  ;;  %v1376_v11 = vld [vmem:[#allocation5 + $0x30] sm:$0xff]  ;;  %2127 = vmatpush3.bf16.msra.mxu0 %v2124_v10 }
 0x508   :  { %v1112_v15 = vsub.f32 2.0, %v1111_v13 }
 0x50a   :  { %v1113_v16 = vmul.f32 %v2187_v12, %v1112_v15  ;;  %v1377_v12 = vld [vmem:[#allocation5 + $0x38] sm:$0xff] }
 0x50b   :  { %v2128_v13 = vpack.c.bf16 %v1377_v12, %v1376_v11 }
 0x50d   :  { %2129 = vmatprep.subr.bf16.mxu0 %v2128_v13 }
 0x50e   :  { %2131 = vmatpush3.bf16.msra.mxu0 %v2128_v13 }
 0x5c5   :  { %v2016_v19 = vpop.f32.mrb[16].mxu1 }
 0x5c6   :  { %v1115_v20 = vmul.f32 %v2016_v19, %v1113_v16  ;;  %v1101_v21 = vpop.f32.mrb[17].mxu1 }
 0x5c7   :  { %v1114_v22 = vmul.f32 %v1113_v16, %v1101_v21 }
 0x5c9   :  { %v2021_v23 = vpop.f32.mrb[18].mxu1  ;;  %1386 = vxpose.xlu0.b32.cont [5/8] (short) (narrow) %v1114_v22, 32 }
 0x5ca   :  { %v1232_v24 = vadd.f32 %v2021_v23, %v2605_v45  ;;  %v1226_v25 = vpop.f32.mrb[19].mxu1 }
 0x5cb   :  { %v1227_v26 = vadd.f32 %v1226_v25, %v2607_v46 }
 0x5cc   :  { %v1246_v27 = vsel %vm143_vm0, %v1232_v24, -inf }
 0x5cd   :  { %v1245_v28 = vsel %vm143_vm0, %v1227_v26, -inf  ;;  %v2024_v29 = vpop.f32.mrb[20].mxu1  ;;  %1387 = vxpose.xlu0.b32.cont [6/8] (short) (narrow) %v1115_v20, 32 }
 0x5ce   :  { %v1249_v30 = vmax.f32 %v1245_v28, %v1246_v27  ;;  %v1242_v31 = vadd.f32 %v2024_v29, %v2613_v54  ;;  %v1236_v32 = vpop.f32.mrb[21].mxu1 }
 0x5cf   :  { %v1237_v33 = vadd.f32 %v1236_v32, %v2615_v55 }
 0x5d0   :  { %v1248_v34 = vsel %vm143_vm0, %v1242_v31, -inf }
 0x5d1   :  { %v1247_v35 = vsel %vm143_vm0, %v1237_v33, -inf }
 0x5d2   :  { %v1250_v45 = vmax.f32 %v1247_v35, %v1248_v34  ;;  %v1379_v34 = vld [vmem:[#allocation7 + $0x8] sm:$0xff]  ;;  %v1378_v35 = vld [vmem:[#allocation7] sm:$0xff] }
 0x5d4   :  { %v1251_v36 = vmax.f32 %v1249_v30, %v1250_v45 }
 0x5d6   :  { %v1252_v37 = vrot.slane %v1251_v36, 4 }
 0x5d8   :  { %v1253_v46 = vmax.f32 %v1251_v36, %v1252_v37 }
 0x5da   :  { %v1254_v38 = vrot.slane %v1253_v46, 2 }
 0x5dc   :  { %v1255_v14 = vmax.f32 %v1253_v46, %v1254_v38 }
 0x5de   :  { %v1256_v39 = vrot.slane %v1255_v14, 1 }
 0x5e0   :  { %v1257_v41 = vmax.f32 %v1255_v14, %v1256_v39  ;;  %v1380_v39 = vld [vmem:[#allocation7 + $0x10] sm:$0xff] }
 0x5e2   :  { %v1260_v42 = vsub.f32 %v1237_v33, %v1257_v41  ;;  %v1258_v43 = vsub.f32 %v1227_v26, %v1257_v41  ;;  %v1259_v44 = vsub.f32 %v1232_v24, %v1257_v41  ;;  %v1261_v47 = vsub.f32 %v1242_v31, %v1257_v41 }
 0x5e4   :  { %v1266_v54 = vmul.f32 1.442695, %v1260_v42  ;;  %v1262_v48 = vmul.f32 1.442695, %v1258_v43  ;;  %v1264_v49 = vmul.f32 1.442695, %v1259_v44 }
 0x5e5   :  { %v1268_v55 = vmul.f32 1.442695, %v1261_v47  ;;  %v1381_v42 = vld [vmem:[#allocation7 + $0x18] sm:$0xff] }
 0x5e6   :  { %2188 = vpow2.f32 %v1266_v54 }
 0x5e7   :  { %2190 = vpow2.f32 %v1262_v48 }
 0x5e8   :  { %2192 = vpow2.f32 %v1264_v49 }
 0x5e9   :  { %2194 = vpow2.f32 %v1268_v55 }
 0x5f0   :  { %v2189_v50 = vpop.eup %2188 }
 0x5f1   :  { %v2191_v51 = vpop.eup %2190  ;;  %v1273_v60 = vsel %vm143_vm0, %v2189_v50, 0.0 }
 0x5f2   :  { %v2193_v52 = vpop.eup %2192  ;;  %v1270_v53 = vsel %vm143_vm0, %v2191_v51, 0.0 }
 0x5f3   :  { %v2195_v18 = vpop.eup %2194  ;;  %v2108_v40 = vpack.c.bf16 %v2193_v52, %v2191_v51  ;;  %v1271_v57 = vsel %vm143_vm0, %v2193_v52, 0.0 }
 0x5f4   :  { %v2112_v58 = vpack.c.bf16 %v2195_v18, %v2189_v50  ;;  %v1272_v59 = vadd.f32 %v1271_v57, %v1270_v53  ;;  %v1275_v62 = vsel %vm143_vm0, %v2195_v18, 0.0 }
 0x5f5   :  { %2109 = vmatprep.subr.bf16.mxu1 %v2108_v40 }
 0x5f6   :  { %2111 = vmatpush3.bf16.msra.mxu1 %v2108_v40  ;;  %v1274_v61 = vadd.f32 %v1273_v60, %v1272_v59 }
 0x5f7   :  { %2113 = vmatprep.subr.bf16.mxu1 %v2112_v58 }
 0x5f8   :  { %v1276_v1 = vadd.f32 %v1275_v62, %v1274_v61 }
 0x5fa   :  { %2115 = vmatpush3.bf16.msra.mxu1 %v2112_v58  ;;  %v1277_v4 = vrot.slane %v1276_v1, 4 }
 0x5fc   :  { %v1278_v15 = vadd.f32 %v1277_v4, %v1276_v1 }
 0x5fd   :  { %2034 = vmatmul.mubr.msk.f32.vlgmr.msra.gmra.mrb[22].mxu1 %vm143_vm0, %v346_v2 }
 0x5fe   :  { %v1279_v16 = vrot.slane %v1278_v15, 2 }
 0x600   :  { %v1280_v19 = vadd.f32 %v1279_v16, %v1278_v15 }
 0x602   :  { %v1281_v20 = vrot.slane %v1280_v19, 1 }
 0x604   :  { %v1282_v21 = vadd.f32 %v1281_v20, %v1280_v19  ;;  %v1566_v19 = vld [vmem:[%s2835_s5 + $0x8] sm:$0xff] }
 0x606   :  { %2196 = vrcp.f32 %v1282_v21 }
 0x610   :  { %v2197_v22 = vpop.eup %2196 }
 0x611   :  { %v1365_v23 = vmul.f32 %v2197_v22, %v1282_v21 }
 0x613   :  { %v1366_v24 = vsub.f32 2.0, %v1365_v23 }
 0x615   :  { %v1367_v25 = vmul.f32 %v2197_v22, %v1366_v24  ;;  %v1574_v22 = vld [vmem:[%s2836_s6 + $0x8] sm:$0xff] }
 0x6d0   :  { %v2035_v26 = vpop.f32.mrb[22].mxu1 }
 0x6d1   :  { %v1369_v27 = vmul.f32 %v2035_v26, %v1367_v25  ;;  %v1355_v28 = vpop.f32.mrb[23].mxu1 }
 0x6d2   :  { %v1368_v29 = vmul.f32 %v1367_v25, %v1355_v28  ;;  %v1565_v25 = vld [vmem:[%s2835_s5] sm:$0xff] }
 0x6d3   :  { %v1573_v28 = vld [vmem:[%s2836_s6] sm:$0xff] }
 0x6d4   :  { %1388 = vxpose.xlu0.b32.cont [7/8] (short) (narrow) %v1368_v29, 32 }
 0x6d8   :  { %1389 = vxpose.xlu0.b32.end [8/8] (short) (narrow) %v1369_v27, 32 }
 0x73c   :  { %v1398_v30 = vpop.trf.xlu0 }
 0x73d   :  { %2052 = vmatprep.mubr.msk.f32.mxu0 %vm1414_vm3, %v1398_v30 }
 0x740   :  { %v1399_v31 = vpop.trf.xlu0 }
 0x741   :  { %2053 = vmatmul.mubr.msk.f32.vlgmr.msra.gmra.mrb[16].mxu0 %vm1414_vm3, %v1399_v31 }
 0x744   :  { %v1400_v32 = vpop.trf.xlu0 }
 0x745   :  { %2055 = vmatprep.mubr.msk.f32.mxu0 %vm1414_vm3, %v1400_v32  ;;  %v1567_v32 = vld [vmem:[%s2835_s5 + $0x10] sm:$0xff] }
 0x748   :  { %v1401_v33 = vpop.trf.xlu0 }
 0x749   :  { %2056 = vmatmul.mubr.msk.f32.gmra.mrb[18].mxu0 %vm1414_vm3, %v1401_v33 }
 0x814   :  { %v2054_v45 = vpop.f32.mrb[16].mxu0 }
 0x815   :  { %v1499_v36 = vadd.f32 %v2054_v45, %v1379_v34  ;;  %v1493_v37 = vpop.f32.mrb[17].mxu0 }
 0x816   :  { %v1494_v46 = vadd.f32 %v1493_v37, %v1378_v35  ;;  %v1575_v35 = vld [vmem:[%s2836_s6 + $0x10] sm:$0xff] }
 0x817   :  { %v1515_v38 = vsel %vm143_vm0, %v1499_v36, 0.0 }
 0x818   :  { %1516 = vadd.xlane.f32.xlu0 %v1515_v38  ;;  %v1512_v14 = vsel %vm143_vm0, %v1494_v46, 0.0  ;;  %v1568_v38 = vld [vmem:[%s2835_s5 + $0x18] sm:$0xff]  ;;  %s2385_s5 = smov [#allocation11]  }
 0x819   :  { %1513 = vadd.xlane.f32.xlu1 %v1512_v14 }
 0x81c   :  { %v2057_v41 = vpop.f32.mrb[18].mxu0 }
 0x81d   :  { %v1503_v43 = vpop.f32.mrb[19].mxu0  ;;  %v1509_v47 = vadd.f32 %v2057_v41, %v1381_v42  ;;  %v1576_v41 = vld [vmem:[%s2836_s6 + $0x18] sm:$0xff]  ;;  %s1760_s6 = sshll.u32 %s2385_s5, 4  ;;  %s1761_s6 = int_to_ptr.vmem [resolvable:$true] %s1760_s6 }
 0x81e   :  { %v1504_v44 = vadd.f32 %v1503_v43, %v1380_v39  ;;  %s2324_s1 = scalar_lea.vmem %s1761_s6, 512  ;;  %p2329_p13 = scmp.lt.s32.totalorder %s1761_s6, %s1761_s6 }
 0x81f   :  { %v1521_v48 = vsel %vm143_vm0, %v1509_v47, 0.0  ;;  %p2325_p12 = scmp.ne.s32.totalorder %s1761_s6, %s2324_s1  ;;  %p2330_p0 = scmp.lt.s32.totalorder %s2324_s1, %s2324_s1 }
 0x820   :  { %v1518_v54 = vsel %vm143_vm0, %v1504_v44, 0.0 }
 0x821   :  { %1519 = vadd.xlane.f32.xlu1 %v1518_v54  ;;  %p2331_p1 = por %p2330_p0, %p2329_p13 }
 0x823   :  { %p2332_p2 = pnand %p2331_p1, %p2325_p12 }
 0x825   :  { %1522 = vadd.xlane.f32.xlu1 %v1521_v48 }
 0x8a5   :  { %v1517_v49 = vpop.xlane.xlu0 %1516 }
 0x8a6   :  { %v1526_v55 = vmul.f32 0.03125, %v1517_v49  ;;  %v1514_v50 = vpop.xlane.xlu1 %1513 }
 0x8a7   :  { %v1525_v51 = vmul.f32 0.03125, %v1514_v50 }
 0x8a8   :  { %v1530_v52 = vsub.f32 %v1499_v36, %v1526_v55 }
 0x8a9   :  { %v1529_v53 = vsub.f32 %v1494_v46, %v1525_v51 }
 0x8aa   :  { %v1534_v18 = vmul.f32 %v1530_v52, %v1530_v52 }
 0x8ab   :  { %v1533_v57 = vmul.f32 %v1529_v53, %v1529_v53 }
 0x8ac   :  { %v1540_v40 = vsel %vm143_vm0, %v1534_v18, 0.0 }
 0x8ad   :  { %1541 = vadd.xlane.f32.xlu1 %v1540_v40  ;;  %v1537_v60 = vsel %vm143_vm0, %v1533_v57, 0.0 }
 0x8ae   :  { %v1520_v58 = vpop.xlane.xlu1 %1519 }
 0x8af   :  { %v1527_v59 = vmul.f32 0.03125, %v1520_v58 }
 0x8b1   :  { %v1531_v61 = vsub.f32 %v1504_v44, %v1527_v59  ;;  %1538 = vadd.xlane.f32.xlu1 %v1537_v60 }
 0x8b2   :  { %v1523_v62 = vpop.xlane.xlu1 %1522 }
 0x8b3   :  { %v1528_v63 = vmul.f32 0.03125, %v1523_v62  ;;  %v1535_v1 = vmul.f32 %v1531_v61, %v1531_v61 }
 0x8b5   :  { %v1532_v2 = vsub.f32 %v1509_v47, %v1528_v63  ;;  %v1543_v3 = vsel %vm143_vm0, %v1535_v1, 0.0 }
 0x8b6   :  { %1544 = vadd.xlane.f32.xlu1 %v1543_v3 }
 0x8b7   :  { %v1536_v17 = vmul.f32 %v1532_v2, %v1532_v2 }
 0x8b9   :  { %v1546_v56 = vsel %vm143_vm0, %v1536_v17, 0.0 }
 0x8ba   :  { %1547 = vadd.xlane.f32.xlu1 %v1546_v56  ;;  %v1711_v56 = vld [vmem:[#allocation10 + $0x8] sm:$0xff] }
 0x93a   :  { %v1542_v5 = vpop.xlane.xlu1 %1541 }
 0x93b   :  { %v1550_v6 = vmul.f32 0.03125, %v1542_v5  ;;  %v1710_v5 = vld [vmem:[#allocation10] sm:$0xff] }
 0x93d   :  { %v1554_v7 = vadd.f32 1e-05, %v1550_v6 }
 0x93e   :  { %v1539_v8 = vpop.xlane.xlu1 %1538 }
 0x93f   :  { %2198 = vrsqrt.f32 %v1554_v7  ;;  %v1549_v9 = vmul.f32 0.03125, %v1539_v8  ;;  %v1713_v8 = vld [vmem:[#allocation10 + $0x18] sm:$0xff] }
 0x941   :  { %v1553_v10 = vadd.f32 1e-05, %v1549_v9 }
 0x943   :  { %2200 = vrsqrt.f32 %v1553_v10  ;;  %v1545_v11 = vpop.xlane.xlu1 %1544 }
 0x944   :  { %v1551_v12 = vmul.f32 0.03125, %v1545_v11 }
 0x946   :  { %v1555_v13 = vadd.f32 1e-05, %v1551_v12  ;;  %v1712_v12 = vld [vmem:[#allocation10 + $0x10] sm:$0xff] }
 0x947   :  { %v1548_v4 = vpop.xlane.xlu1 %1547 }
 0x948   :  { %2202 = vrsqrt.f32 %v1555_v13  ;;  %v1552_v15 = vmul.f32 0.03125, %v1548_v4 }
 0x949   :  { %v2199_v16 = vpop.eup %2198 }
 0x94a   :  { %v1556_v20 = vadd.f32 1e-05, %v1552_v15  ;;  %v1562_v21 = vmul.f32 %v2199_v16, %v1530_v52 }
 0x94c   :  { %2204 = vrsqrt.f32 %v1556_v20  ;;  %v1570_v23 = vmul.f32 %v1566_v19, %v1562_v21 }
 0x94d   :  { %v2201_v24 = vpop.eup %2200 }
 0x94e   :  { %v1561_v26 = vmul.f32 %v2201_v24, %v1529_v53  ;;  %v1578_v27 = vadd.f32 %v1574_v22, %v1570_v23 }
 0x950   :  { %v1569_v29 = vmul.f32 %v1565_v25, %v1561_v26  ;;  %1582 = vst.msk [vmem:[#allocation11 + $0x8] sm:$0xff] %vm143_vm0, %v1578_v27  ;;  %v1586_v46 = vmul.f32 %v1578_v27, %v1578_v27 }
 0x952   :  { %v2203_v30 = vpop.eup %2202  ;;  %v1577_v31 = vadd.f32 %v1573_v28, %v1569_v29  ;;  %v1592_v43 = vsel %vm143_vm0, %v1586_v46, 0.0 }
 0x953   :  { %v1563_v33 = vmul.f32 %v2203_v30, %v1531_v61 }
 0x954   :  { %v1585_v34 = vmul.f32 %v1577_v31, %v1577_v31  ;;  %1581 = vst.msk [vmem:[#allocation11] sm:$0xff] %vm143_vm0, %v1577_v31 }
 0x955   :  { %v1571_v45 = vmul.f32 %v1567_v32, %v1563_v33 }
 0x956   :  { %v2205_v36 = vpop.eup %2204  ;;  %v1589_v37 = vsel %vm143_vm0, %v1585_v34, 0.0 }
 0x957   :  { %1590 = vadd.xlane.f32.xlu1 %v1589_v37  ;;  %v1579_v14 = vadd.f32 %v1575_v35, %v1571_v45  ;;  %v1564_v39 = vmul.f32 %v2205_v36, %v1532_v2 }
 0x959   :  { %1583 = vst.msk [vmem:[#allocation11 + $0x10] sm:$0xff] %vm143_vm0, %v1579_v14  ;;  %v1572_v42 = vmul.f32 %v1568_v38, %v1564_v39  ;;  %v1587_v44 = vmul.f32 %v1579_v14, %v1579_v14 }
 0x95b   :  { %1593 = vadd.xlane.f32.xlu1 %v1592_v43  ;;  %v1580_v47 = vadd.f32 %v1576_v41, %v1572_v42  ;;  %v1595_v48 = vsel %vm143_vm0, %v1587_v44, 0.0 }
 0x95d   :  { %v1588_v54 = vmul.f32 %v1580_v47, %v1580_v47  ;;  %1584 = vst.msk [vmem:[#allocation11 + $0x18] sm:$0xff] %vm143_vm0, %v1580_v47 }
 0x95f   :  { %1596 = vadd.xlane.f32.xlu1 %v1595_v48  ;;  %v1598_v49 = vsel %vm143_vm0, %v1588_v54, 0.0 }
 0x960   :  { %1599 = vadd.xlane.f32.xlu0 %v1598_v49 }
 0x9e4   :  { %v1591_v55 = vpop.xlane.xlu1 %1590 }
 0x9e5   :  { %v1601_v50 = vmax.f32 %v1591_v55, 1e-24 }
 0x9e7   :  { %2206 = vrsqrt.f32 %v1601_v50 }
 0x9e8   :  { %v1594_v51 = vpop.xlane.xlu1 %1593 }
 0x9e9   :  { %v1602_v52 = vmax.f32 %v1594_v51, 1e-24 }
 0x9eb   :  { %2208 = vrsqrt.f32 %v1602_v52 }
 0x9ec   :  { %v1597_v53 = vpop.xlane.xlu1 %1596 }
 0x9ed   :  { %v1603_v18 = vmax.f32 %v1597_v53, 1e-24  ;;  %v1600_v40 = vpop.xlane.xlu0 %1599 }
 0x9ee   :  { %v1604_v57 = vmax.f32 %v1600_v40, 1e-24 }
 0x9ef   :  { %2210 = vrsqrt.f32 %v1603_v18 }
 0x9f0   :  { %2212 = vrsqrt.f32 %v1604_v57 }
 0x9f1   :  { %v2207_v58 = vpop.eup %2206 }
 0x9f2   :  { %v1609_v59 = vmul.f32 %v2207_v58, %v1577_v31 }
 0x9f4   :  { %2066 = vmatprep.mubr.msk.f32.mxu0 %vm143_vm0, %v1609_v59 }
 0x9f5   :  { %v2209_v60 = vpop.eup %2208 }
 0x9f6   :  { %v1610_v61 = vmul.f32 %v2209_v60, %v1578_v27 }
 0x9f8   :  { %v2132_v62 = vpack.c.bf16 %v1610_v61, %v1609_v59 }
 0x9f9   :  { %v2211_v63 = vpop.eup %2210 }
 0x9fa   :  { %v2213_v1 = vpop.eup %2212  ;;  %2134 = vmatprep.subr.msk.bf16.mxu0 %vm2538_vm1, %v2132_v62  ;;  %2144 = vmatprep.subr.msk.bf16.mxu1 %vm2538_vm1, %v2132_v62  ;;  %v1611_v2 = vmul.f32 %v2211_v63, %v1579_v14 }
 0x9fb   :  { %2137 = vmatpush3.bf16.xpose.msk.msra.mxu0 %vm2538_vm1, %v2132_v62  ;;  %2146 = vmatpush3.bf16.xpose.msk.msra.mxu1 %vm2538_vm1, %v2132_v62  ;;  %v1612_v3 = vmul.f32 %v2213_v1, %v1580_v47 }
 0x9fc   :  { %2069 = vmatprep.mubr.msk.f32.mxu1 %vm143_vm0, %v1611_v2 }
 0x9fd   :  { %v2138_v17 = vpack.c.bf16 %v1612_v3, %v1611_v2 }
 0x9ff   :  { %2140 = vmatprep.subr.msk.bf16.mxu0 %vm2538_vm1, %v2138_v17  ;;  %2145 = vmatprep.subr.msk.bf16.mxu1 %vm2538_vm1, %v2138_v17 }
 0xa03   :  { %2143 = vmatpush3.bf16.xpose.msk.msra.mxu0 %vm2538_vm1, %v2138_v17  ;;  %2147 = vmatpush3.bf16.xpose.msk.msra.mxu1 %vm2538_vm1, %v2138_v17 }
 0xa0a   :  { %2067 = vmatmul.mubr.msk.f32.vlgmr.msra.gmra.mrb[20].mxu0 %vm143_vm0, %v1610_v61  ;;  %2070 = vmatmul.mubr.msk.f32.vlgmr.msra.gmra.mrb[24].mxu1 %vm143_vm0, %v1612_v3 }
 0xadd   :  { %v2068_v6 = vpop.f32.mrb[20].mxu0  ;;  %v2071_v7 = vpop.f32.mrb[24].mxu1 }
 0xade   :  { %v1715_v9 = vmul.f32 %v2068_v6, %v1711_v56  ;;  %v1691_v10 = vpop.f32.mrb[21].mxu0  ;;  %v1701_v11 = vpop.f32.mrb[25].mxu1  ;;  %v1717_v4 = vmul.f32 %v2071_v7, %v1713_v8 }
 0xadf   :  { %v1714_v13 = vmul.f32 %v1710_v5, %v1691_v10  ;;  %v1716_v16 = vmul.f32 %v1712_v12, %v1701_v11 }
 0xae0   :  { %v1721_v15 = vsel %vm143_vm0, %v1715_v9, 0.0  ;;  %v1727_v19 = vsel %vm143_vm0, %v1717_v4, 0.0 }
 0xae1   :  { %1722 = vadd.xlane.f32.xlu0 %v1721_v15  ;;  %v1718_v0 = vsel %vm143_vm0, %v1714_v13, 0.0  ;;  %v1724_v20 = vsel %vm143_vm0, %v1716_v16, 0.0 }
 0xae2   :  { %1719 = vadd.xlane.f32.xlu1 %v1718_v0 }
 0xae5   :  { %1728 = vadd.xlane.f32.xlu0 %v1727_v19 }
 0xae6   :  { %1725 = vadd.xlane.f32.xlu1 %v1724_v20 }
 0xae7   :  { %2335 = shalt.err (!%p2332_p2)
}
 0xae8   :  { %s2336_s13 = scalar_lea.hbm %s2840_s10, 512 }
 0xae9   :  { %p2337_p3 = scmp.ne.s32.totalorder %s2840_s10, %s2336_s13  ;;  %p2340_p4 = scmp.lt.u32.totalorder %s2336_s13, %s2840_s10 }
 0xaeb   :  { %p2342_p5 = pnand %p2340_p4, %p2337_p3 }
 0xaed   :  { %2345 = shalt.err (!%p2342_p5)
}
 0xaee   :  { %1766 = dma.vmem_to_hbm [thread:$0]  %s1761_s6, 512, %s2840_s10, [#allocation4], %s2380_s29, %s2380_s29, %s2381_s30   ;;  %vm1738_vm4 = vcmask 15360   ;;  %vm1753_vm5 = vcmask 8192  }
 0xaef   :  { %v1731_v21 = vld [vmem:[%s2839_s9 + $0x8] sm:$0xff]  ;;  %v1730_v22 = vld [vmem:[%s2839_s9] sm:$0xff]  ;;  %v1733_v27 = vld [vmem:[%s2839_s9 + $0x18] sm:$0xff]  ;;  %s2386_s10 = smov [#allocation12]  }
 0xaf0   :  { %v1732_v28 = vld [vmem:[%s2839_s9 + $0x10] sm:$0xff]  ;;  %s1773_s29 = sshll.u32 %s2386_s10, 4  ;;  %s1774_s29 = int_to_ptr.vmem [resolvable:$true] %s1773_s29 }
 0xaf1   :  { %s2346_s9 = scalar_lea.vmem %s1774_s29, 16  ;;  %s2350_s30 = scalar_lea.vmem %s1774_s29, 32 }
 0xaf2   :  { %p2347_p6 = scmp.ne.s32.totalorder %s1774_s29, %s2346_s9  ;;  %p2351_p7 = scmp.lt.s32.totalorder %s1774_s29, %s1774_s29 }
 0xaf3   :  { %p2352_p8 = scmp.lt.s32.totalorder %s2350_s30, %s2346_s9 }
 0xaf5   :  { %p2353_p9 = por %p2352_p8, %p2351_p7 }
 0xaf7   :  { %p2354_p10 = pnand %p2353_p9, %p2347_p6 }
 0xb6e   :  { %v1723_v23 = vpop.xlane.xlu0 %1722 }
 0xb6f   :  { %v1735_v24 = vmul.f32 %v1731_v21, %v1723_v23  ;;  %v1720_v25 = vpop.xlane.xlu1 %1719 }
 0xb70   :  { %v1734_v26 = vmul.f32 %v1730_v22, %v1720_v25 }
 0xb71   :  { %v1740_v29 = vsel %vm1738_vm4, %v1735_v24, 0.0 }
 0xb72   :  { %v1739_v30 = vsel %vm1738_vm4, %v1734_v26, 0.0  ;;  %v1729_v31 = vpop.xlane.xlu0 %1728 }
 0xb73   :  { %v1726_v32 = vpop.xlane.xlu1 %1725  ;;  %v1737_v33 = vmul.f32 %v1733_v27, %v1729_v31  ;;  %v1741_v35 = vadd.f32 %v1740_v29, %v1739_v30 }
 0xb74   :  { %v1736_v34 = vmul.f32 %v1732_v28, %v1726_v32 }
 0xb75   :  { %v1744_v37 = vsel %vm1738_vm4, %v1737_v33, 0.0 }
 0xb76   :  { %v1742_v45 = vsel %vm1738_vm4, %v1736_v34, 0.0 }
 0xb77   :  { %v1743_v36 = vadd.f32 %v1742_v45, %v1741_v35 }
 0xb79   :  { %v1745_v46 = vadd.f32 %v1744_v37, %v1743_v36 }
 0xb7b   :  { %v1746_v38 = vrot.slane %v1745_v46, 4 }
 0xb7d   :  { %v1747_v14 = vadd.f32 %v1746_v38, %v1745_v46 }
 0xb7f   :  { %v1748_v39 = vrot.slane %v1747_v14, 2 }
 0xb81   :  { %v1749_v41 = vadd.f32 %v1748_v39, %v1747_v14 }
 0xb83   :  { %v1750_v42 = vrot.slane %v1749_v41, 1 }
 0xb85   :  { %v1751_v43 = vadd.f32 %v1750_v42, %v1749_v41 }
 0xb87   :  { %v1752_v44 = vadd.f32 0.75, %v1751_v43 }
 0xb89   :  { %1754 = vst.msk [vmem:[#allocation12] sm:$0x1] %vm1753_vm5, %v1752_v44 }
 0xb8a   :  { %2357 = shalt.err (!%p2354_p10)
}
 0xb8b   :  { %s2358_s24 = scalar_lea.hbm %s2841_s11, 16 }
 0xb8c   :  { %p2359_p11 = scmp.ne.s32.totalorder %s2841_s11, %s2358_s24  ;;  %p2362_p12 = scmp.lt.u32.totalorder %s2358_s24, %s2841_s11 }
 0xb8e   :  { %p2364_p13 = pnand %p2362_p12, %p2359_p11 }
 0xb90   :  { %2367 = shalt.err (!%p2364_p13)
}
 0xb91   :  { %1776 = dma.vmem_to_hbm [thread:$0]  %s1774_s29, 16, %s2841_s11, [#allocation13]  }
 0xb92   :  { %2374 = dma.done.wait [#allocation4], 512  }
 0xb93   :  { %2375 = vsyncadd [#allocation4], 4294966784 }
 0xb94   :  { %2376 = dma.done.wait [#allocation13], 16  }
 0xb95   :  { %2377 = vsyncadd [#allocation13], 4294967280 }
 0xb96   :  { %1783 = vsyncpa [#allocation3], 1 }
 0xb97   :  { %1784 = vsyncpa [#allocation6], 1 }
 0xb98   :  { %1785 = vsyncpa [#allocation9], 1 }
 0xb99   :  { %1786 = vsyncpa [#allocation4], 1 }
 0xb9a   :  { %1787 = vsyncpa [#allocation13], 1 }

</bundles_post_ra>
